<compile_context>
chip_gen: v5e
topology: v5e:2x2
jax: 0.10.0
libtpu: 0.0.40
codegen_flags: <defaults>
</compile_context>

<pallas_src>
import functools

import jax
import jax.numpy as jnp
import numpy as np
from jax.experimental import pallas as pl
from jax.experimental.pallas import tpu as pltpu

GROUP = 8  # samples per statically-unrolled inner block (one sublane tile)


def _rlse_kernel(data_ref, at_ref, s_ref, theta_ref, *, gamma):
    """data_ref: (G, GROUP, n+1) packed [a | b] rows, batch-major / row-minor order
       at_ref:   (G, n, GROUP)   per-group transposed copy of the `a` rows
       s_ref     (out, grid-resident): (n, n)
       theta_ref (out, grid-resident): (1, n)   theta kept lane-dense as a row vector
    """
    n = s_ref.shape[0]
    n_groups = data_ref.shape[0]

    # Initialise the recursion state once, on the first grid step
    # (same init as the PyTorch __init__: S = gamma * I, theta = 0).
    @pl.when(pl.program_id(0) == 0)
    def _():
        rows = jax.lax.broadcasted_iota(jnp.int32, (n, n), 0)
        cols = jax.lax.broadcasted_iota(jnp.int32, (n, n), 1)
        s_ref[...] = jnp.where(rows == cols, gamma, 0.0).astype(jnp.float32)
        theta_ref[...] = jnp.zeros_like(theta_ref)

    def group_body(g, carry):
        S, th = carry                       # S: (n, n), th: (1, n) — live in vregs
        grp = data_ref[g]                   # (GROUP, n+1): one dynamic load per 8 samples
        at = at_ref[g]                      # (n, GROUP)
        a_rows = grp[:, :n]                 # (GROUP, n)
        b_vals = grp[:, n:n + 1]            # (GROUP, 1)

        for i in range(GROUP):              # static unroll: 8 sequential RLSE steps
            a_row = a_rows[i:i + 1, :]      # (1, n)
            a_col = at[:, i:i + 1]          # (n, 1)

            Sa_col = jnp.sum(S * a_row, axis=1, keepdims=True)   # (n,1) = S @ a^T
            Sa_row = jnp.sum(a_col * S, axis=0, keepdims=True)   # (1,n) = a @ S
            denom = 1.0 + jnp.sum(Sa_row * a_row)                # 1 + a S a^T (scalar)
            inv = 1.0 / denom                                    # exact scalar reciprocal
            Sa_row_s = Sa_row * inv

            # Sherman–Morrison rank-1 update (the single in-place torch statement).
            S = S - Sa_col * Sa_row_s

            # theta uses the UPDATED S; exact identity: S_new @ a^T == Sa_col * inv,
            # whose row form is Sa_row_s (no third (n,n) reduction needed).
            err = jnp.sum(b_vals[i:i + 1, :]) - jnp.sum(a_row * th)
            th = th + err * Sa_row_s

        return S, th

    S, th = jax.lax.fori_loop(0, n_groups, group_body, (s_ref[...], theta_ref[...]))
    s_ref[...] = S
    theta_ref[...] = th


def rlse_forward(A, B, initial_gamma=1000.0, samples_per_chunk=512):
    """Runs the RLSE recursion over all (batch, row) samples in order; returns (S, theta)."""
    batch, rows, n = A.shape
    T = batch * rows

    A2 = A.astype(jnp.float32).reshape(T, n)
    B2 = B.astype(jnp.float32).reshape(T, 1)
    data = jnp.concatenate([A2, B2], axis=1)          # (T, n+1) lane-dense packed rows

    # Pad with zero rows: a == 0 is an exact no-op for the recursion
    # (Sa = 0, denom = 1, err-term contributes 0), so padding never changes results.
    t_pad = -(-T // GROUP) * GROUP
    chunk = min(samples_per_chunk, t_pad)
    chunk = -(-chunk // GROUP) * GROUP
    t_pad = -(-t_pad // chunk) * chunk
    if t_pad != T:
        data = jnp.pad(data, ((0, t_pad - T), (0, 0)))

    g_total = t_pad // GROUP
    g_chunk = chunk // GROUP
    data_g = data.reshape(g_total, GROUP, n + 1)
    # Pre-transposed copy of the `a` rows (grouped) so the kernel never transposes.
    at_g = jnp.transpose(data_g[:, :, :n], (0, 2, 1))  # (g_total, n, GROUP)

    kernel = functools.partial(_rlse_kernel, gamma=float(initial_gamma))

    S, theta_row = pl.pallas_call(
        kernel,
        grid=(g_total // g_chunk,),
        in_specs=[
            pl.BlockSpec((g_chunk, GROUP, n + 1), lambda g: (g, 0, 0)),
            pl.BlockSpec((g_chunk, n, GROUP), lambda g: (g, 0, 0)),
        ],
        out_specs=(
            pl.BlockSpec((n, n), lambda g: (0, 0)),   # state stays resident across grid
            pl.BlockSpec((1, n), lambda g: (0, 0)),
        ),
        out_shape=(
            jax.ShapeDtypeStruct((n, n), jnp.float32),
            jax.ShapeDtypeStruct((1, n), jnp.float32),
        ),
        compiler_params=pltpu.CompilerParams(
            dimension_semantics=("arbitrary",)),
    )(data_g, at_g)
    return S, theta_row.reshape(n, 1)


def rlse_reference(A, B, initial_gamma=1000.0):
    """Pure-JAX reference reproducing the PyTorch loop exactly."""
    batch, rows, n = A.shape
    T = batch * rows
    A2 = A.astype(jnp.float32).reshape(T, n)
    Bf = B.astype(jnp.float32).reshape(T)

    def step(carry, inp):
        S, th = carry
        a_vec, b = inp
        a = a_vec.reshape(1, n)
        S = S - (S @ a.T) @ (a @ S) / (1.0 + a @ S @ a.T)
        th = th + S @ (a.T * (b - a @ th))
        return (S, th), None

    S0 = jnp.eye(n, dtype=jnp.float32) * initial_gamma
    th0 = jnp.zeros((n, 1), dtype=jnp.float32)
    (S, th), _ = jax.lax.scan(step, (S0, th0), (A2, Bf))
    return S, th


if __name__ == "__main__":
    key = jax.random.PRNGKey(0)
    k1, k2, k3 = jax.random.split(key, 3)

    batch, rows, n_vars = 2, 8, 8
    # Well-conditioned synthetic regression problem: B = A @ x_true + noise
    A = jax.random.normal(k1, (batch, rows, n_vars), dtype=jnp.float32)
    x_true = jax.random.normal(k2, (n_vars, 1), dtype=jnp.float32)
    B = (A.reshape(-1, n_vars) @ x_true).reshape(batch, rows) \
        + 0.01 * jax.random.normal(k3, (batch, rows), dtype=jnp.float32)

    S, theta = rlse_forward(A, B, initial_gamma=1000.0)
    jax.block_until_ready((S, theta))

    S_ref, theta_ref = rlse_reference(A, B, initial_gamma=1000.0)

    np.testing.assert_allclose(np.asarray(theta), np.asarray(theta_ref),
                               rtol=1e-3, atol=1e-3)
    np.testing.assert_allclose(np.asarray(S), np.asarray(S_ref),
                               rtol=1e-3, atol=1e-3)

    print("KERNEL_OK")
</pallas_src>

<mosaic_0001>
module attributes {stable_mosaic.version = 11 : i64} {
  func.func @_rlse_kernel(%arg0: i32, %arg1: memref<2x8x9xf32, #tpu.memory_space<vmem>>, %arg2: memref<2x8x8xf32, #tpu.memory_space<vmem>>, %arg3: memref<8x8xf32, #tpu.memory_space<vmem>>, %arg4: memref<1x8xf32, #tpu.memory_space<vmem>>) attributes {dimension_semantics = [#tpu.dimension_semantics<arbitrary>], iteration_bounds = array<i64: 1>, scalar_prefetch = 0 : i64, scratch_operands = 0 : i64, tpu.core_type = #tpu.core_type<tc>, window_params = [{transform_indices = @transform_0, window_bounds = array<i64: 2, 8, 9>}, {transform_indices = @transform_1, window_bounds = array<i64: 2, 8, 8>}, {pipeline_mode = #tpu.pipeline_mode<synchronous>, transform_indices = @transform_2, window_bounds = array<i64: 8, 8>}, {pipeline_mode = #tpu.pipeline_mode<synchronous>, transform_indices = @transform_3, window_bounds = array<i64: 1, 8>}]} {
    %c0_i32 = arith.constant 0 : i32
    %0 = arith.cmpi eq, %arg0, %c0_i32 : i32
    %1 = arith.extui %0 : i1 to i32
    %c0_i32_0 = arith.constant 0 : i32
    %2 = arith.cmpi ne, %1, %c0_i32_0 : i32
    scf.if %2 {
      %9 = tpu.iota {dimensions = array<i32: 0>} : vector<8x8xi32>
      %10 = tpu.iota {dimensions = array<i32: 1>} : vector<8x8xi32>
      %11 = arith.cmpi eq, %9, %10 : vector<8x8xi32>
      %cst = arith.constant 1.000000e+03 : f32
      %cst_10 = arith.constant 0.000000e+00 : f32
      %12 = vector.broadcast %cst : f32 to vector<8x8xf32>
      %13 = vector.broadcast %cst_10 : f32 to vector<8x8xf32>
      %14 = arith.select %11, %12, %13 : vector<8x8xi1>, vector<8x8xf32>
      %c0_11 = arith.constant 0 : index
      %c0_12 = arith.constant 0 : index
      %15 = vector.load %arg3[%c0_11, %c0_12] : memref<8x8xf32, #tpu.memory_space<vmem>>, vector<8x8xf32>
      tpu.vector_store %arg3[%c0_11, %c0_12], %14 {strides = array<i32>} : memref<8x8xf32, #tpu.memory_space<vmem>>, vector<8x8xf32>,
      %cst_13 = arith.constant 0.000000e+00 : f32
      %16 = vector.broadcast %cst_13 : f32 to vector<1x8xf32>
      %c0_14 = arith.constant 0 : index
      %c0_15 = arith.constant 0 : index
      %17 = vector.load %arg4[%c0_14, %c0_15] : memref<1x8xf32, #tpu.memory_space<vmem>>, vector<1x8xf32>
      tpu.vector_store %arg4[%c0_14, %c0_15], %16 {strides = array<i32>} : memref<1x8xf32, #tpu.memory_space<vmem>>, vector<1x8xf32>,
    } else {
    }
    %c0 = arith.constant 0 : index
    %c0_1 = arith.constant 0 : index
    %3 = vector.load %arg3[%c0, %c0_1] : memref<8x8xf32, #tpu.memory_space<vmem>>, vector<8x8xf32>
    %c0_2 = arith.constant 0 : index
    %c0_3 = arith.constant 0 : index
    %4 = vector.load %arg4[%c0_2, %c0_3] : memref<1x8xf32, #tpu.memory_space<vmem>>, vector<1x8xf32>
    %c0_i32_4 = arith.constant 0 : i32
    %c2_i32 = arith.constant 2 : i32
    %5 = arith.addi %c0_i32_4, %c2_i32 : i32
    %c1_i32 = arith.constant 1 : i32
    %6:2 = scf.for %arg5 = %c0_i32_4 to %5 step %c1_i32 iter_args(%arg6 = %3, %arg7 = %4) -> (vector<8x8xf32>, vector<1x8xf32>)  : i32 {
      %9 = arith.index_cast %arg5 : i32 to index
      %c0_10 = arith.constant 0 : index
      %c0_11 = arith.constant 0 : index
      %10 = vector.load %arg1[%9, %c0_10, %c0_11] : memref<2x8x9xf32, #tpu.memory_space<vmem>>, vector<1x8x9xf32>
      %11 = vector.shape_cast %10 : vector<1x8x9xf32> to vector<8x9xf32>
      %12 = arith.index_cast %arg5 : i32 to index
      %c0_12 = arith.constant 0 : index
      %c0_13 = arith.constant 0 : index
      %13 = vector.load %arg2[%12, %c0_12, %c0_13] : memref<2x8x8xf32, #tpu.memory_space<vmem>>, vector<1x8x8xf32>
      %14 = vector.shape_cast %13 : vector<1x8x8xf32> to vector<8x8xf32>
      %15 = vector.extract_strided_slice %11 {offsets = [0, 0], sizes = [8, 8], strides = [1, 1]} : vector<8x9xf32> to vector<8x8xf32>
      %16 = vector.extract_strided_slice %11 {offsets = [0, 8], sizes = [8, 1], strides = [1, 1]} : vector<8x9xf32> to vector<8x1xf32>
      %17 = vector.extract_strided_slice %15 {offsets = [0, 0], sizes = [1, 8], strides = [1, 1]} : vector<8x8xf32> to vector<1x8xf32>
      %18 = vector.extract_strided_slice %14 {offsets = [0, 0], sizes = [8, 1], strides = [1, 1]} : vector<8x8xf32> to vector<8x1xf32>
      %19 = vector.broadcast %17 : vector<1x8xf32> to vector<8x8xf32>
      %20 = arith.mulf %arg6, %19 : vector<8x8xf32>
      %cst = arith.constant dense<0.000000e+00> : vector<8xf32>
      %21 = vector.multi_reduction <add>, %20, %cst [1] : vector<8x8xf32> to vector<8xf32>
      %22 = vector.shape_cast %21 : vector<8xf32> to vector<8x1xf32>
      %23 = vector.broadcast %18 : vector<8x1xf32> to vector<8x8xf32>
      %24 = arith.mulf %23, %arg6 : vector<8x8xf32>
      %cst_14 = arith.constant dense<0.000000e+00> : vector<8xf32>
      %25 = vector.multi_reduction <add>, %24, %cst_14 [0] : vector<8x8xf32> to vector<8xf32>
      %26 = vector.shape_cast %25 : vector<8xf32> to vector<1x8xf32>
      %27 = arith.mulf %26, %17 : vector<1x8xf32>
      %28 = vector.shape_cast %27 : vector<1x8xf32> to vector<1x1x8xf32>
      %cst_15 = arith.constant dense<0.000000e+00> : vector<1xf32>
      %29 = vector.multi_reduction <add>, %28, %cst_15 [1, 2] : vector<1x1x8xf32> to vector<1xf32>
      %30 = vector.shape_cast %29 : vector<1xf32> to vector<1x1x1xf32>
      %31 = vector.extract %30[0, 0, 0] : f32 from vector<1x1x1xf32>
      %cst_16 = arith.constant 1.000000e+00 : f32
      %32 = arith.addf %cst_16, %31 : f32
      %cst_17 = arith.constant 1.000000e+00 : f32
      %33 = arith.divf %cst_17, %32 : f32
      %34 = vector.broadcast %33 : f32 to vector<1x8xf32>
      %35 = arith.mulf %26, %34 : vector<1x8xf32>
      %36 = vector.broadcast %22 : vector<8x1xf32> to vector<8x8xf32>
      %37 = vector.broadcast %35 : vector<1x8xf32> to vector<8x8xf32>
      %38 = arith.mulf %36, %37 : vector<8x8xf32>
      %39 = arith.subf %arg6, %38 : vector<8x8xf32>
      %40 = vector.extract_strided_slice %16 {offsets = [0, 0], sizes = [1, 1], strides = [1, 1]} : vector<8x1xf32> to vector<1x1xf32>
      %41 = vector.shape_cast %40 : vector<1x1xf32> to vector<1x1x1xf32>
      %cst_18 = arith.constant dense<0.000000e+00> : vector<1xf32>
      %42 = vector.multi_reduction <add>, %41, %cst_18 [1, 2] : vector<1x1x1xf32> to vector<1xf32>
      %43 = vector.shape_cast %42 : vector<1xf32> to vector<1x1x1xf32>
      %44 = vector.extract %43[0, 0, 0] : f32 from vector<1x1x1xf32>
      %45 = arith.mulf %17, %arg7 : vector<1x8xf32>
      %46 = vector.shape_cast %45 : vector<1x8xf32> to vector<1x1x8xf32>
      %cst_19 = arith.constant dense<0.000000e+00> : vector<1xf32>
      %47 = vector.multi_reduction <add>, %46, %cst_19 [1, 2] : vector<1x1x8xf32> to vector<1xf32>
      %48 = vector.shape_cast %47 : vector<1xf32> to vector<1x1x1xf32>
      %49 = vector.extract %48[0, 0, 0] : f32 from vector<1x1x1xf32>
      %50 = arith.subf %44, %49 : f32
      %51 = vector.broadcast %50 : f32 to vector<1x8xf32>
      %52 = arith.mulf %51, %35 : vector<1x8xf32>
      %53 = arith.addf %arg7, %52 : vector<1x8xf32>
      %54 = vector.extract_strided_slice %15 {offsets = [1, 0], sizes = [1, 8], strides = [1, 1]} : vector<8x8xf32> to vector<1x8xf32>
      %55 = vector.extract_strided_slice %14 {offsets = [0, 1], sizes = [8, 1], strides = [1, 1]} : vector<8x8xf32> to vector<8x1xf32>
      %56 = vector.broadcast %54 : vector<1x8xf32> to vector<8x8xf32>
      %57 = arith.mulf %39, %56 : vector<8x8xf32>
      %cst_20 = arith.constant dense<0.000000e+00> : vector<8xf32>
      %58 = vector.multi_reduction <add>, %57, %cst_20 [1] : vector<8x8xf32> to vector<8xf32>
      %59 = vector.shape_cast %58 : vector<8xf32> to vector<8x1xf32>
      %60 = vector.broadcast %55 : vector<8x1xf32> to vector<8x8xf32>
      %61 = arith.mulf %60, %39 : vector<8x8xf32>
      %cst_21 = arith.constant dense<0.000000e+00> : vector<8xf32>
      %62 = vector.multi_reduction <add>, %61, %cst_21 [0] : vector<8x8xf32> to vector<8xf32>
      %63 = vector.shape_cast %62 : vector<8xf32> to vector<1x8xf32>
      %64 = arith.mulf %63, %54 : vector<1x8xf32>
      %65 = vector.shape_cast %64 : vector<1x8xf32> to vector<1x1x8xf32>
      %cst_22 = arith.constant dense<0.000000e+00> : vector<1xf32>
      %66 = vector.multi_reduction <add>, %65, %cst_22 [1, 2] : vector<1x1x8xf32> to vector<1xf32>
      %67 = vector.shape_cast %66 : vector<1xf32> to vector<1x1x1xf32>
      %68 = vector.extract %67[0, 0, 0] : f32 from vector<1x1x1xf32>
      %cst_23 = arith.constant 1.000000e+00 : f32
      %69 = arith.addf %cst_23, %68 : f32
      %cst_24 = arith.constant 1.000000e+00 : f32
      %70 = arith.divf %cst_24, %69 : f32
      %71 = vector.broadcast %70 : f32 to vector<1x8xf32>
      %72 = arith.mulf %63, %71 : vector<1x8xf32>
      %73 = vector.broadcast %59 : vector<8x1xf32> to vector<8x8xf32>
      %74 = vector.broadcast %72 : vector<1x8xf32> to vector<8x8xf32>
      %75 = arith.mulf %73, %74 : vector<8x8xf32>
      %76 = arith.subf %39, %75 : vector<8x8xf32>
      %77 = vector.extract_strided_slice %16 {offsets = [1, 0], sizes = [1, 1], strides = [1, 1]} : vector<8x1xf32> to vector<1x1xf32>
      %78 = vector.shape_cast %77 : vector<1x1xf32> to vector<1x1x1xf32>
      %cst_25 = arith.constant dense<0.000000e+00> : vector<1xf32>
      %79 = vector.multi_reduction <add>, %78, %cst_25 [1, 2] : vector<1x1x1xf32> to vector<1xf32>
      %80 = vector.shape_cast %79 : vector<1xf32> to vector<1x1x1xf32>
      %81 = vector.extract %80[0, 0, 0] : f32 from vector<1x1x1xf32>
      %82 = arith.mulf %54, %53 : vector<1x8xf32>
      %83 = vector.shape_cast %82 : vector<1x8xf32> to vector<1x1x8xf32>
      %cst_26 = arith.constant dense<0.000000e+00> : vector<1xf32>
      %84 = vector.multi_reduction <add>, %83, %cst_26 [1, 2] : vector<1x1x8xf32> to vector<1xf32>
      %85 = vector.shape_cast %84 : vector<1xf32> to vector<1x1x1xf32>
      %86 = vector.extract %85[0, 0, 0] : f32 from vector<1x1x1xf32>
      %87 = arith.subf %81, %86 : f32
      %88 = vector.broadcast %87 : f32 to vector<1x8xf32>
      %89 = arith.mulf %88, %72 : vector<1x8xf32>
      %90 = arith.addf %53, %89 : vector<1x8xf32>
      %91 = vector.extract_strided_slice %15 {offsets = [2, 0], sizes = [1, 8], strides = [1, 1]} : vector<8x8xf32> to vector<1x8xf32>
      %92 = vector.extract_strided_slice %14 {offsets = [0, 2], sizes = [8, 1], strides = [1, 1]} : vector<8x8xf32> to vector<8x1xf32>
      %93 = vector.broadcast %91 : vector<1x8xf32> to vector<8x8xf32>
      %94 = arith.mulf %76, %93 : vector<8x8xf32>
      %cst_27 = arith.constant dense<0.000000e+00> : vector<8xf32>
      %95 = vector.multi_reduction <add>, %94, %cst_27 [1] : vector<8x8xf32> to vector<8xf32>
      %96 = vector.shape_cast %95 : vector<8xf32> to vector<8x1xf32>
      %97 = vector.broadcast %92 : vector<8x1xf32> to vector<8x8xf32>
      %98 = arith.mulf %97, %76 : vector<8x8xf32>
      %cst_28 = arith.constant dense<0.000000e+00> : vector<8xf32>
      %99 = vector.multi_reduction <add>, %98, %cst_28 [0] : vector<8x8xf32> to vector<8xf32>
      %100 = vector.shape_cast %99 : vector<8xf32> to vector<1x8xf32>
      %101 = arith.mulf %100, %91 : vector<1x8xf32>
      %102 = vector.shape_cast %101 : vector<1x8xf32> to vector<1x1x8xf32>
      %cst_29 = arith.constant dense<0.000000e+00> : vector<1xf32>
      %103 = vector.multi_reduction <add>, %102, %cst_29 [1, 2] : vector<1x1x8xf32> to vector<1xf32>
      %104 = vector.shape_cast %103 : vector<1xf32> to vector<1x1x1xf32>
      %105 = vector.extract %104[0, 0, 0] : f32 from vector<1x1x1xf32>
      %cst_30 = arith.constant 1.000000e+00 : f32
      %106 = arith.addf %cst_30, %105 : f32
      %cst_31 = arith.constant 1.000000e+00 : f32
      %107 = arith.divf %cst_31, %106 : f32
      %108 = vector.broadcast %107 : f32 to vector<1x8xf32>
      %109 = arith.mulf %100, %108 : vector<1x8xf32>
      %110 = vector.broadcast %96 : vector<8x1xf32> to vector<8x8xf32>
      %111 = vector.broadcast %109 : vector<1x8xf32> to vector<8x8xf32>
      %112 = arith.mulf %110, %111 : vector<8x8xf32>
      %113 = arith.subf %76, %112 : vector<8x8xf32>
      %114 = vector.extract_strided_slice %16 {offsets = [2, 0], sizes = [1, 1], strides = [1, 1]} : vector<8x1xf32> to vector<1x1xf32>
      %115 = vector.shape_cast %114 : vector<1x1xf32> to vector<1x1x1xf32>
      %cst_32 = arith.constant dense<0.000000e+00> : vector<1xf32>
      %116 = vector.multi_reduction <add>, %115, %cst_32 [1, 2] : vector<1x1x1xf32> to vector<1xf32>
      %117 = vector.shape_cast %116 : vector<1xf32> to vector<1x1x1xf32>
      %118 = vector.extract %117[0, 0, 0] : f32 from vector<1x1x1xf32>
      %119 = arith.mulf %91, %90 : vector<1x8xf32>
      %120 = vector.shape_cast %119 : vector<1x8xf32> to vector<1x1x8xf32>
      %cst_33 = arith.constant dense<0.000000e+00> : vector<1xf32>
      %121 = vector.multi_reduction <add>, %120, %cst_33 [1, 2] : vector<1x1x8xf32> to vector<1xf32>
      %122 = vector.shape_cast %121 : vector<1xf32> to vector<1x1x1xf32>
      %123 = vector.extract %122[0, 0, 0] : f32 from vector<1x1x1xf32>
      %124 = arith.subf %118, %123 : f32
      %125 = vector.broadcast %124 : f32 to vector<1x8xf32>
      %126 = arith.mulf %125, %109 : vector<1x8xf32>
      %127 = arith.addf %90, %126 : vector<1x8xf32>
      %128 = vector.extract_strided_slice %15 {offsets = [3, 0], sizes = [1, 8], strides = [1, 1]} : vector<8x8xf32> to vector<1x8xf32>
      %129 = vector.extract_strided_slice %14 {offsets = [0, 3], sizes = [8, 1], strides = [1, 1]} : vector<8x8xf32> to vector<8x1xf32>
      %130 = vector.broadcast %128 : vector<1x8xf32> to vector<8x8xf32>
      %131 = arith.mulf %113, %130 : vector<8x8xf32>
      %cst_34 = arith.constant dense<0.000000e+00> : vector<8xf32>
      %132 = vector.multi_reduction <add>, %131, %cst_34 [1] : vector<8x8xf32> to vector<8xf32>
      %133 = vector.shape_cast %132 : vector<8xf32> to vector<8x1xf32>
      %134 = vector.broadcast %129 : vector<8x1xf32> to vector<8x8xf32>
      %135 = arith.mulf %134, %113 : vector<8x8xf32>
      %cst_35 = arith.constant dense<0.000000e+00> : vector<8xf32>
      %136 = vector.multi_reduction <add>, %135, %cst_35 [0] : vector<8x8xf32> to vector<8xf32>
      %137 = vector.shape_cast %136 : vector<8xf32> to vector<1x8xf32>
      %138 = arith.mulf %137, %128 : vector<1x8xf32>
      %139 = vector.shape_cast %138 : vector<1x8xf32> to vector<1x1x8xf32>
      %cst_36 = arith.constant dense<0.000000e+00> : vector<1xf32>
      %140 = vector.multi_reduction <add>, %139, %cst_36 [1, 2] : vector<1x1x8xf32> to vector<1xf32>
      %141 = vector.shape_cast %140 : vector<1xf32> to vector<1x1x1xf32>
      %142 = vector.extract %141[0, 0, 0] : f32 from vector<1x1x1xf32>
      %cst_37 = arith.constant 1.000000e+00 : f32
      %143 = arith.addf %cst_37, %142 : f32
      %cst_38 = arith.constant 1.000000e+00 : f32
      %144 = arith.divf %cst_38, %143 : f32
      %145 = vector.broadcast %144 : f32 to vector<1x8xf32>
      %146 = arith.mulf %137, %145 : vector<1x8xf32>
      %147 = vector.broadcast %133 : vector<8x1xf32> to vector<8x8xf32>
      %148 = vector.broadcast %146 : vector<1x8xf32> to vector<8x8xf32>
      %149 = arith.mulf %147, %148 : vector<8x8xf32>
      %150 = arith.subf %113, %149 : vector<8x8xf32>
      %151 = vector.extract_strided_slice %16 {offsets = [3, 0], sizes = [1, 1], strides = [1, 1]} : vector<8x1xf32> to vector<1x1xf32>
      %152 = vector.shape_cast %151 : vector<1x1xf32> to vector<1x1x1xf32>
      %cst_39 = arith.constant dense<0.000000e+00> : vector<1xf32>
      %153 = vector.multi_reduction <add>, %152, %cst_39 [1, 2] : vector<1x1x1xf32> to vector<1xf32>
      %154 = vector.shape_cast %153 : vector<1xf32> to vector<1x1x1xf32>
      %155 = vector.extract %154[0, 0, 0] : f32 from vector<1x1x1xf32>
      %156 = arith.mulf %128, %127 : vector<1x8xf32>
      %157 = vector.shape_cast %156 : vector<1x8xf32> to vector<1x1x8xf32>
      %cst_40 = arith.constant dense<0.000000e+00> : vector<1xf32>
      %158 = vector.multi_reduction <add>, %157, %cst_40 [1, 2] : vector<1x1x8xf32> to vector<1xf32>
      %159 = vector.shape_cast %158 : vector<1xf32> to vector<1x1x1xf32>
      %160 = vector.extract %159[0, 0, 0] : f32 from vector<1x1x1xf32>
      %161 = arith.subf %155, %160 : f32
      %162 = vector.broadcast %161 : f32 to vector<1x8xf32>
      %163 = arith.mulf %162, %146 : vector<1x8xf32>
      %164 = arith.addf %127, %163 : vector<1x8xf32>
      %165 = vector.extract_strided_slice %15 {offsets = [4, 0], sizes = [1, 8], strides = [1, 1]} : vector<8x8xf32> to vector<1x8xf32>
      %166 = vector.extract_strided_slice %14 {offsets = [0, 4], sizes = [8, 1], strides = [1, 1]} : vector<8x8xf32> to vector<8x1xf32>
      %167 = vector.broadcast %165 : vector<1x8xf32> to vector<8x8xf32>
      %168 = arith.mulf %150, %167 : vector<8x8xf32>
      %cst_41 = arith.constant dense<0.000000e+00> : vector<8xf32>
      %169 = vector.multi_reduction <add>, %168, %cst_41 [1] : vector<8x8xf32> to vector<8xf32>
      %170 = vector.shape_cast %169 : vector<8xf32> to vector<8x1xf32>
      %171 = vector.broadcast %166 : vector<8x1xf32> to vector<8x8xf32>
      %172 = arith.mulf %171, %150 : vector<8x8xf32>
      %cst_42 = arith.constant dense<0.000000e+00> : vector<8xf32>
      %173 = vector.multi_reduction <add>, %172, %cst_42 [0] : vector<8x8xf32> to vector<8xf32>
      %174 = vector.shape_cast %173 : vector<8xf32> to vector<1x8xf32>
      %175 = arith.mulf %174, %165 : vector<1x8xf32>
      %176 = vector.shape_cast %175 : vector<1x8xf32> to vector<1x1x8xf32>
      %cst_43 = arith.constant dense<0.000000e+00> : vector<1xf32>
      %177 = vector.multi_reduction <add>, %176, %cst_43 [1, 2] : vector<1x1x8xf32> to vector<1xf32>
      %178 = vector.shape_cast %177 : vector<1xf32> to vector<1x1x1xf32>
      %179 = vector.extract %178[0, 0, 0] : f32 from vector<1x1x1xf32>
      %cst_44 = arith.constant 1.000000e+00 : f32
      %180 = arith.addf %cst_44, %179 : f32
      %cst_45 = arith.constant 1.000000e+00 : f32
      %181 = arith.divf %cst_45, %180 : f32
      %182 = vector.broadcast %181 : f32 to vector<1x8xf32>
      %183 = arith.mulf %174, %182 : vector<1x8xf32>
      %184 = vector.broadcast %170 : vector<8x1xf32> to vector<8x8xf32>
      %185 = vector.broadcast %183 : vector<1x8xf32> to vector<8x8xf32>
      %186 = arith.mulf %184, %185 : vector<8x8xf32>
      %187 = arith.subf %150, %186 : vector<8x8xf32>
      %188 = vector.extract_strided_slice %16 {offsets = [4, 0], sizes = [1, 1], strides = [1, 1]} : vector<8x1xf32> to vector<1x1xf32>
      %189 = vector.shape_cast %188 : vector<1x1xf32> to vector<1x1x1xf32>
      %cst_46 = arith.constant dense<0.000000e+00> : vector<1xf32>
      %190 = vector.multi_reduction <add>, %189, %cst_46 [1, 2] : vector<1x1x1xf32> to vector<1xf32>
      %191 = vector.shape_cast %190 : vector<1xf32> to vector<1x1x1xf32>
      %192 = vector.extract %191[0, 0, 0] : f32 from vector<1x1x1xf32>
      %193 = arith.mulf %165, %164 : vector<1x8xf32>
      %194 = vector.shape_cast %193 : vector<1x8xf32> to vector<1x1x8xf32>
      %cst_47 = arith.constant dense<0.000000e+00> : vector<1xf32>
      %195 = vector.multi_reduction <add>, %194, %cst_47 [1, 2] : vector<1x1x8xf32> to vector<1xf32>
      %196 = vector.shape_cast %195 : vector<1xf32> to vector<1x1x1xf32>
      %197 = vector.extract %196[0, 0, 0] : f32 from vector<1x1x1xf32>
      %198 = arith.subf %192, %197 : f32
      %199 = vector.broadcast %198 : f32 to vector<1x8xf32>
      %200 = arith.mulf %199, %183 : vector<1x8xf32>
      %201 = arith.addf %164, %200 : vector<1x8xf32>
      %202 = vector.extract_strided_slice %15 {offsets = [5, 0], sizes = [1, 8], strides = [1, 1]} : vector<8x8xf32> to vector<1x8xf32>
      %203 = vector.extract_strided_slice %14 {offsets = [0, 5], sizes = [8, 1], strides = [1, 1]} : vector<8x8xf32> to vector<8x1xf32>
      %204 = vector.broadcast %202 : vector<1x8xf32> to vector<8x8xf32>
      %205 = arith.mulf %187, %204 : vector<8x8xf32>
      %cst_48 = arith.constant dense<0.000000e+00> : vector<8xf32>
      %206 = vector.multi_reduction <add>, %205, %cst_48 [1] : vector<8x8xf32> to vector<8xf32>
      %207 = vector.shape_cast %206 : vector<8xf32> to vector<8x1xf32>
      %208 = vector.broadcast %203 : vector<8x1xf32> to vector<8x8xf32>
      %209 = arith.mulf %208, %187 : vector<8x8xf32>
      %cst_49 = arith.constant dense<0.000000e+00> : vector<8xf32>
      %210 = vector.multi_reduction <add>, %209, %cst_49 [0] : vector<8x8xf32> to vector<8xf32>
      %211 = vector.shape_cast %210 : vector<8xf32> to vector<1x8xf32>
      %212 = arith.mulf %211, %202 : vector<1x8xf32>
      %213 = vector.shape_cast %212 : vector<1x8xf32> to vector<1x1x8xf32>
      %cst_50 = arith.constant dense<0.000000e+00> : vector<1xf32>
      %214 = vector.multi_reduction <add>, %213, %cst_50 [1, 2] : vector<1x1x8xf32> to vector<1xf32>
      %215 = vector.shape_cast %214 : vector<1xf32> to vector<1x1x1xf32>
      %216 = vector.extract %215[0, 0, 0] : f32 from vector<1x1x1xf32>
      %cst_51 = arith.constant 1.000000e+00 : f32
      %217 = arith.addf %cst_51, %216 : f32
      %cst_52 = arith.constant 1.000000e+00 : f32
      %218 = arith.divf %cst_52, %217 : f32
      %219 = vector.broadcast %218 : f32 to vector<1x8xf32>
      %220 = arith.mulf %211, %219 : vector<1x8xf32>
      %221 = vector.broadcast %207 : vector<8x1xf32> to vector<8x8xf32>
      %222 = vector.broadcast %220 : vector<1x8xf32> to vector<8x8xf32>
      %223 = arith.mulf %221, %222 : vector<8x8xf32>
      %224 = arith.subf %187, %223 : vector<8x8xf32>
      %225 = vector.extract_strided_slice %16 {offsets = [5, 0], sizes = [1, 1], strides = [1, 1]} : vector<8x1xf32> to vector<1x1xf32>
      %226 = vector.shape_cast %225 : vector<1x1xf32> to vector<1x1x1xf32>
      %cst_53 = arith.constant dense<0.000000e+00> : vector<1xf32>
      %227 = vector.multi_reduction <add>, %226, %cst_53 [1, 2] : vector<1x1x1xf32> to vector<1xf32>
      %228 = vector.shape_cast %227 : vector<1xf32> to vector<1x1x1xf32>
      %229 = vector.extract %228[0, 0, 0] : f32 from vector<1x1x1xf32>
      %230 = arith.mulf %202, %201 : vector<1x8xf32>
      %231 = vector.shape_cast %230 : vector<1x8xf32> to vector<1x1x8xf32>
      %cst_54 = arith.constant dense<0.000000e+00> : vector<1xf32>
      %232 = vector.multi_reduction <add>, %231, %cst_54 [1, 2] : vector<1x1x8xf32> to vector<1xf32>
      %233 = vector.shape_cast %232 : vector<1xf32> to vector<1x1x1xf32>
      %234 = vector.extract %233[0, 0, 0] : f32 from vector<1x1x1xf32>
      %235 = arith.subf %229, %234 : f32
      %236 = vector.broadcast %235 : f32 to vector<1x8xf32>
      %237 = arith.mulf %236, %220 : vector<1x8xf32>
      %238 = arith.addf %201, %237 : vector<1x8xf32>
      %239 = vector.extract_strided_slice %15 {offsets = [6, 0], sizes = [1, 8], strides = [1, 1]} : vector<8x8xf32> to vector<1x8xf32>
      %240 = vector.extract_strided_slice %14 {offsets = [0, 6], sizes = [8, 1], strides = [1, 1]} : vector<8x8xf32> to vector<8x1xf32>
      %241 = vector.broadcast %239 : vector<1x8xf32> to vector<8x8xf32>
      %242 = arith.mulf %224, %241 : vector<8x8xf32>
      %cst_55 = arith.constant dense<0.000000e+00> : vector<8xf32>
      %243 = vector.multi_reduction <add>, %242, %cst_55 [1] : vector<8x8xf32> to vector<8xf32>
      %244 = vector.shape_cast %243 : vector<8xf32> to vector<8x1xf32>
      %245 = vector.broadcast %240 : vector<8x1xf32> to vector<8x8xf32>
      %246 = arith.mulf %245, %224 : vector<8x8xf32>
      %cst_56 = arith.constant dense<0.000000e+00> : vector<8xf32>
      %247 = vector.multi_reduction <add>, %246, %cst_56 [0] : vector<8x8xf32> to vector<8xf32>
      %248 = vector.shape_cast %247 : vector<8xf32> to vector<1x8xf32>
      %249 = arith.mulf %248, %239 : vector<1x8xf32>
      %250 = vector.shape_cast %249 : vector<1x8xf32> to vector<1x1x8xf32>
      %cst_57 = arith.constant dense<0.000000e+00> : vector<1xf32>
      %251 = vector.multi_reduction <add>, %250, %cst_57 [1, 2] : vector<1x1x8xf32> to vector<1xf32>
      %252 = vector.shape_cast %251 : vector<1xf32> to vector<1x1x1xf32>
      %253 = vector.extract %252[0, 0, 0] : f32 from vector<1x1x1xf32>
      %cst_58 = arith.constant 1.000000e+00 : f32
      %254 = arith.addf %cst_58, %253 : f32
      %cst_59 = arith.constant 1.000000e+00 : f32
      %255 = arith.divf %cst_59, %254 : f32
      %256 = vector.broadcast %255 : f32 to vector<1x8xf32>
      %257 = arith.mulf %248, %256 : vector<1x8xf32>
      %258 = vector.broadcast %244 : vector<8x1xf32> to vector<8x8xf32>
      %259 = vector.broadcast %257 : vector<1x8xf32> to vector<8x8xf32>
      %260 = arith.mulf %258, %259 : vector<8x8xf32>
      %261 = arith.subf %224, %260 : vector<8x8xf32>
      %262 = vector.extract_strided_slice %16 {offsets = [6, 0], sizes = [1, 1], strides = [1, 1]} : vector<8x1xf32> to vector<1x1xf32>
      %263 = vector.shape_cast %262 : vector<1x1xf32> to vector<1x1x1xf32>
      %cst_60 = arith.constant dense<0.000000e+00> : vector<1xf32>
      %264 = vector.multi_reduction <add>, %263, %cst_60 [1, 2] : vector<1x1x1xf32> to vector<1xf32>
      %265 = vector.shape_cast %264 : vector<1xf32> to vector<1x1x1xf32>
      %266 = vector.extract %265[0, 0, 0] : f32 from vector<1x1x1xf32>
      %267 = arith.mulf %239, %238 : vector<1x8xf32>
      %268 = vector.shape_cast %267 : vector<1x8xf32> to vector<1x1x8xf32>
      %cst_61 = arith.constant dense<0.000000e+00> : vector<1xf32>
      %269 = vector.multi_reduction <add>, %268, %cst_61 [1, 2] : vector<1x1x8xf32> to vector<1xf32>
      %270 = vector.shape_cast %269 : vector<1xf32> to vector<1x1x1xf32>
      %271 = vector.extract %270[0, 0, 0] : f32 from vector<1x1x1xf32>
      %272 = arith.subf %266, %271 : f32
      %273 = vector.broadcast %272 : f32 to vector<1x8xf32>
      %274 = arith.mulf %273, %257 : vector<1x8xf32>
      %275 = arith.addf %238, %274 : vector<1x8xf32>
      %276 = vector.extract_strided_slice %15 {offsets = [7, 0], sizes = [1, 8], strides = [1, 1]} : vector<8x8xf32> to vector<1x8xf32>
      %277 = vector.extract_strided_slice %14 {offsets = [0, 7], sizes = [8, 1], strides = [1, 1]} : vector<8x8xf32> to vector<8x1xf32>
      %278 = vector.broadcast %276 : vector<1x8xf32> to vector<8x8xf32>
      %279 = arith.mulf %261, %278 : vector<8x8xf32>
      %cst_62 = arith.constant dense<0.000000e+00> : vector<8xf32>
      %280 = vector.multi_reduction <add>, %279, %cst_62 [1] : vector<8x8xf32> to vector<8xf32>
      %281 = vector.shape_cast %280 : vector<8xf32> to vector<8x1xf32>
      %282 = vector.broadcast %277 : vector<8x1xf32> to vector<8x8xf32>
      %283 = arith.mulf %282, %261 : vector<8x8xf32>
      %cst_63 = arith.constant dense<0.000000e+00> : vector<8xf32>
      %284 = vector.multi_reduction <add>, %283, %cst_63 [0] : vector<8x8xf32> to vector<8xf32>
      %285 = vector.shape_cast %284 : vector<8xf32> to vector<1x8xf32>
      %286 = arith.mulf %285, %276 : vector<1x8xf32>
      %287 = vector.shape_cast %286 : vector<1x8xf32> to vector<1x1x8xf32>
      %cst_64 = arith.constant dense<0.000000e+00> : vector<1xf32>
      %288 = vector.multi_reduction <add>, %287, %cst_64 [1, 2] : vector<1x1x8xf32> to vector<1xf32>
      %289 = vector.shape_cast %288 : vector<1xf32> to vector<1x1x1xf32>
      %290 = vector.extract %289[0, 0, 0] : f32 from vector<1x1x1xf32>
      %cst_65 = arith.constant 1.000000e+00 : f32
      %291 = arith.addf %cst_65, %290 : f32
      %cst_66 = arith.constant 1.000000e+00 : f32
      %292 = arith.divf %cst_66, %291 : f32
      %293 = vector.broadcast %292 : f32 to vector<1x8xf32>
      %294 = arith.mulf %285, %293 : vector<1x8xf32>
      %295 = vector.broadcast %281 : vector<8x1xf32> to vector<8x8xf32>
      %296 = vector.broadcast %294 : vector<1x8xf32> to vector<8x8xf32>
      %297 = arith.mulf %295, %296 : vector<8x8xf32>
      %298 = arith.subf %261, %297 : vector<8x8xf32>
      %299 = vector.extract_strided_slice %16 {offsets = [7, 0], sizes = [1, 1], strides = [1, 1]} : vector<8x1xf32> to vector<1x1xf32>
      %300 = vector.shape_cast %299 : vector<1x1xf32> to vector<1x1x1xf32>
      %cst_67 = arith.constant dense<0.000000e+00> : vector<1xf32>
      %301 = vector.multi_reduction <add>, %300, %cst_67 [1, 2] : vector<1x1x1xf32> to vector<1xf32>
      %302 = vector.shape_cast %301 : vector<1xf32> to vector<1x1x1xf32>
      %303 = vector.extract %302[0, 0, 0] : f32 from vector<1x1x1xf32>
      %304 = arith.mulf %276, %275 : vector<1x8xf32>
      %305 = vector.shape_cast %304 : vector<1x8xf32> to vector<1x1x8xf32>
      %cst_68 = arith.constant dense<0.000000e+00> : vector<1xf32>
      %306 = vector.multi_reduction <add>, %305, %cst_68 [1, 2] : vector<1x1x8xf32> to vector<1xf32>
      %307 = vector.shape_cast %306 : vector<1xf32> to vector<1x1x1xf32>
      %308 = vector.extract %307[0, 0, 0] : f32 from vector<1x1x1xf32>
      %309 = arith.subf %303, %308 : f32
      %310 = vector.broadcast %309 : f32 to vector<1x8xf32>
      %311 = arith.mulf %310, %294 : vector<1x8xf32>
      %312 = arith.addf %275, %311 : vector<1x8xf32>
      scf.yield %298, %312 : vector<8x8xf32>, vector<1x8xf32>
    }
    %c2_i32_5 = arith.constant 2 : i32
    %c0_6 = arith.constant 0 : index
    %c0_7 = arith.constant 0 : index
    %7 = vector.load %arg3[%c0_6, %c0_7] : memref<8x8xf32, #tpu.memory_space<vmem>>, vector<8x8xf32>
    tpu.vector_store %arg3[%c0_6, %c0_7], %6#0 {strides = array<i32>} : memref<8x8xf32, #tpu.memory_space<vmem>>, vector<8x8xf32>,
    %c0_8 = arith.constant 0 : index
    %c0_9 = arith.constant 0 : index
    %8 = vector.load %arg4[%c0_8, %c0_9] : memref<1x8xf32, #tpu.memory_space<vmem>>, vector<1x8xf32>
    tpu.vector_store %arg4[%c0_8, %c0_9], %6#1 {strides = array<i32>} : memref<1x8xf32, #tpu.memory_space<vmem>>, vector<1x8xf32>,
    return
  }
  func.func @transform_0(%arg0: i32) -> (i32, i32, i32) {
    %c0_i32 = arith.constant 0 : i32
    %c0_i32_0 = arith.constant 0 : i32
    %c0_i32_1 = arith.constant 0 : i32
    return %arg0, %c0_i32, %c0_i32_0 : i32, i32, i32
  }
  func.func @transform_1(%arg0: i32) -> (i32, i32, i32) {
    %c0_i32 = arith.constant 0 : i32
    %c0_i32_0 = arith.constant 0 : i32
    %c0_i32_1 = arith.constant 0 : i32
    return %arg0, %c0_i32, %c0_i32_0 : i32, i32, i32
  }
  func.func @transform_2(%arg0: i32) -> (i32, i32) {
    %c0_i32 = arith.constant 0 : i32
    %c0_i32_0 = arith.constant 0 : i32
    %c0_i32_1 = arith.constant 0 : i32
    return %c0_i32, %c0_i32_0 : i32, i32
  }
  func.func @transform_3(%arg0: i32) -> (i32, i32) {
    %c0_i32 = arith.constant 0 : i32
    %c0_i32_0 = arith.constant 0 : i32
    %c0_i32_1 = arith.constant 0 : i32
    return %c0_i32, %c0_i32_0 : i32, i32
  }
}

</mosaic_0001>

<bundles_post_ra>
// kernel: tpu_custom_call.1
= control target key start
LH: loop header
LB: loop body
LE: loop exit
PB: predicated region body
PF: predicated region fallthrough
CT: control target
= control target key end

     0   :  { %9 = vsyncpa [#allocation3], 0  ;;  %s1239_s0 = inlined_call_operand.hbm [shape: f32[2,8,9], index: 0, kind: input, shape index: {}]   ;;  %s1240_s1 = inlined_call_operand.hbm [shape: f32[2,8,8], index: 1, kind: input, shape index: {}]   ;;  %s1241_s2 = inlined_call_operand.hbm [shape: f32[8,8], index: 2, kind: output, shape index: {0}]   ;;  %s1242_s3 = inlined_call_operand.hbm [shape: f32[1,8], index: 3, kind: output, shape index: {1}]  }
   0x1   :  { %10 = vsyncpa [#allocation6], 0 }
   0x2   :  { %11 = vsyncpa [#allocation4], 0 }
   0x3   :  { %12 = vsyncpa [#allocation9], 0  ;;  %s17_s14 = sshll.u32 %s1239_s0, 4  ;;  %s1007_s15 = smov [#allocation2]   ;;  %s18_s14 = int_to_ptr.hbm [resolvable:$true] %s17_s14 }
   0x4   :  { %s19_s16 = sshll.u32 %s1007_s15, 4  ;;  %s30_s19 = sshll.u32 %s1240_s1, 4  ;;  %s20_s16 = int_to_ptr.vmem [resolvable:$true] %s19_s16  ;;  %s31_s19 = int_to_ptr.hbm [resolvable:$true] %s30_s19 }
   0x5   :  { %s1008_s20 = smov 128   ;;  %s1009_s21 = smov 8  }
   0x6   :  { %25 = dma.hbm_to_vmem [thread:$0]  %s18_s14, 256, %s20_s16, [#allocation3], %s1008_s20, %s1008_s20, %s1009_s21  }
   0x7   :  { %s1010_s22 = smov [#allocation5]  }
   0x8   :  { %s32_s23 = sshll.u32 %s1010_s22, 4  ;;  %s33_s23 = int_to_ptr.vmem [resolvable:$true] %s32_s23 }
   0x9   :  { %38 = dma.hbm_to_vmem [thread:$0]  %s31_s19, 256, %s33_s23, [#allocation6], %s1008_s20, %s1008_s20, %s1009_s21  }
   0xa   :  { %987 = dma.done.wait [#allocation3], 256  }
   0xb   :  { %988 = vsyncadd [#allocation3], 4294967040 }
   0xc   :  { %989 = dma.done.wait [#allocation6], 256  }
   0xd   :  { %990 = vsyncadd [#allocation6], 4294967040  ;;  %v51_v0 = vlaneseq  ;;  %vm59_vm0 = vcmask 57344   ;;  %v1011_v1 = vmov 0.0   ;;  %vm57_vm1 = vcmask 64512   ;;  %s1055_s0 = smov 0  }
   0xe   :  { %60 = vst.msk [vmem:[#allocation8] sm:$0x1] %vm59_vm0, %v1011_v1 }
   0xf   :  { %v52_v2 = vshrl.u32 %v51_v0, 7  ;;  %v54_v3 = vand.u32 127, %v51_v0 }
  0x11   :  { %vm55_vm2 = vcmp.eq.s32.totalorder %v52_v2, %v54_v3 }
  0x12   :  { %v56_v4 = vsel %vm55_vm2, 1000.0, %v1011_v1 }
  0x13   :  { %58 = vst.msk [vmem:[#allocation7] sm:$0xff] %vm57_vm1, %v56_v4 }
  0x15   :  { %v62_v5 = vld [vmem:[#allocation8] sm:$0x1]  }
  0x1a   :  { %v61_v6 = vld [vmem:[#allocation7] sm:$0xff]  }
  0x1b LB: > { %v1012_v7 = vmov 0   ;;  %s748_s1 = sshll.u32 %s1005_s0, 3  ;;  %v1013_v24 = vmov 1   ;;  %s1014_s29 = smov 120   ;;  %v1015_v1 = vmov 2   ;;  %s1005_s0 = sphi %s1055_s0, %s68_s0   ;;  %v1001_v6 = vphi %v61_v6, %v1244_v6   ;;  %v997_v5 = vphi %v62_v5, %v1243_v5  }
  0x1c   : > { %853 = vset.pattern.permute.xlu0 %v1012_v7  ;;  %s74_s24 = scalar_lea.vmem [#allocation5], %s748_s1  ;;  %s1072_s25 = scalar_lea.vmem [#allocation2], %s748_s1  ;;  %854 = vset.pattern.permute.xlu1 %v1013_v24 }
  0x1d   : > { %v1067_v8 = vld [vmem:[%s74_s24] sm:$0xff]  ;;  %855 = vset.pattern.permute.xlu2 %v1015_v1  ;;  %s68_s0 = sadd.s32 1, %s1005_s0  }
  0x1e   : > { %84 = vperm.xlu0 %853, %v1067_v8   ;;  %v1075_v17 = vld [vmem:[%s1072_s25] sm:$0xff]  ;;  %p65_p0 = scmp.ge.s32.totalorder %s68_s0, 2  }
  0x1f   : > { %v76_v21 = vperm.slane %v1075_v17, 0  ;;  %v134_v43 = vmul.f32 %v997_v5, %v1075_v17  ;;  %v149_v49 = vperm.slane %v1075_v17, 1  ;;  %s717_s0 = sshll.u32 (%p65_p0), %s1242_s3, 4  ;;  %s718_s0 = int_to_ptr.hbm [resolvable:$true] %s717_s0 }
  0x21   : > { %v77_v22 = vmul.f32 %v1001_v6, %v76_v21  ;;  %v135_v44 = vsel %vm59_vm0, %v134_v43, 0.0 }
  0x22   : > { %136 = vadd.xlane.f32.xlu2 %v135_v44 }
  0x23   : > { %v79_v23 = vsel %vm57_vm1, %v77_v22, 0.0 }
  0x24   : > { %80 = vadd.xlane.f32.xlu1 %v79_v23 }
  0x3d   : > { %155 = vperm.xlu1 %854, %v1067_v8  }
  0x90   : > { %v85_v9 = vpop.permute.xlu0 %84 }
  0x91   : > { %v87_v10 = vmul.f32 %v1001_v6, %v85_v9 }
  0x93   : > { %v88_v11 = vsel %vm57_vm1, %v87_v10, 0.0 }
  0x94   : > { %v89_v12 = vrot.slane %v88_v11, 4 }
  0x95   : > { %v137_v2 = vpop.xlane.xlu2 %136 }
  0x96   : > { %v90_v13 = vadd.f32 %v89_v12, %v88_v11  ;;  %v138_v3 = vrot.slane %v137_v2, 4 }
  0x97   : > { %v81_v45 = vpop.xlane.xlu1 %80 }
  0x98   : > { %v91_v14 = vrot.slane %v90_v13, 2  ;;  %v139_v4 = vadd.f32 %v138_v3, %v137_v2 }
  0x9a   : > { %v92_v15 = vadd.f32 %v91_v14, %v90_v13 }
  0x9c   : > { %v93_v16 = vrot.slane %v92_v15, 1 }
  0x9e   : > { %v94_v18 = vadd.f32 %v93_v16, %v92_v15 }
  0xa0   : > { %v95_v19 = vmul.f32 %v94_v18, %v1075_v17 }
  0xa2   : > { %v97_v20 = vsel %vm59_vm0, %v95_v19, 0.0 }
  0xa3   : > { %98 = vadd.xlane.f32.xlu0 %v97_v20 }
  0xaf   : > { %v156_v50 = vpop.permute.xlu1 %155 }
 0x116   : > { %v99_v25 = vpop.xlane.xlu0 %98 }
 0x117   : > { %v100_v26 = vrot.slane %v99_v25, 4 }
 0x119   : > { %v101_v27 = vadd.f32 %v100_v26, %v99_v25 }
 0x11b   : > { %v102_v28 = vrot.slane %v101_v27, 2 }
 0x11d   : > { %v103_v29 = vadd.f32 %v102_v28, %v101_v27 }
 0x11f   : > { %v104_v30 = vrot.slane %v103_v29, 1 }
 0x121   : > { %v105_v31 = vadd.f32 %v104_v30, %v103_v29 }
 0x123   : > { %749 = vpush %v105_v31 }
 0x154   : > { %s750_s26 = spop %749 }
 0x155   : > { %s107_s27 = sadd.f32 1.0, %s750_s26 }
 0x157   : > { %v108_v32 = vstv %s107_s27 }
 0x158   : > { %862 = vrcp.f32 %v108_v32  ;;  %v120_v36 = vand.u32 2147483648, %v108_v32  ;;  %v118_v38 = vand.u32 2147483647, %v108_v32  ;;  %vm114_vm4 = vweird.f32 %v108_v32 }
 0x15a   : > { %v121_v40 = vor.u32 1.1754944e-38, %v120_v36  ;;  %vm119_vm6 = vcmp.eq.f32.partialorder %v118_v38, 8.507059e+37 }
 0x15e   : > { %v863_v33 = vpop.eup %862 }
 0x15f   : > { %v110_v34 = vmul.f32 %v863_v33, %v108_v32  ;;  %vm115_vm3 = vweird.f32 %v863_v33 }
 0x160   : > { %vm116_vm5 = vmor %vm114_vm4, %vm115_vm3 }
 0x161   : > { %v111_v35 = vsub.f32 1.0, %v110_v34 }
 0x163   : > { %v112_v37 = vmul.f32 %v863_v33, %v111_v35 }
 0x165   : > { %v113_v39 = vadd.f32 %v863_v33, %v112_v37 }
 0x167   : > { %v117_v41 = vsel %vm116_vm5, %v863_v33, %v113_v39 }
 0x168   : > { %v122_v42 = vsel %vm119_vm6, %v121_v40, %v117_v41  ;;  %v227_v41 = vperm.slane %v1075_v17, 2 }
 0x169   : > { %751 = vpush %v122_v42 }
 0x19a   : > { %s752_s28 = spop %751 }
 0x19b   : > { %v124_v46 = vstv %s752_s28 }
 0x19c   : > { %v125_v47 = vmul.f32 %v124_v46, %v94_v18 }
 0x19e   : > { %v126_v48 = vmul.f32 %v125_v47, %v81_v45 }
 0x1a0   : > { %v1088_v51 = vsub.f32 %v1001_v6, %v126_v48  ;;  %v140_v6 = vrot.slane %v139_v4, 2 }
 0x1a2   : > { %v158_v52 = vmul.f32 %v156_v50, %v1088_v51  ;;  %v150_v53 = vmul.f32 %v149_v49, %v1088_v51  ;;  %v141_v9 = vadd.f32 %v140_v6, %v139_v4 }
 0x1a4   : > { %v159_v54 = vsel %vm57_vm1, %v158_v52, 0.0  ;;  %v151_v55 = vsel %vm57_vm1, %v150_v53, 0.0  ;;  %v142_v12 = vrot.slane %v141_v9, 1 }
 0x1a5   : > { %v160_v56 = vrot.slane %v159_v54, 4  ;;  %152 = vadd.xlane.f32.xlu1 %v151_v55 }
 0x1a6   : > { %v143_v16 = vadd.f32 %v142_v12, %v141_v9 }
 0x1a7   : > { %v161_v57 = vadd.f32 %v160_v56, %v159_v54 }
 0x1a9   : > { %v162_v58 = vrot.slane %v161_v57, 2 }
 0x1ab   : > { %v163_v59 = vadd.f32 %v162_v58, %v161_v57  ;;  %v201_v57 = vrot.slane %v1075_v17, 1  ;;  %v1016_v58 = vmov 3  }
 0x1ac   : > { %856 = vset.pattern.permute.xlu0 %v1016_v58 }
 0x1ad   : > { %v164_v60 = vrot.slane %v163_v59, 1 }
 0x1af   : > { %v165_v61 = vadd.f32 %v164_v60, %v163_v59 }
 0x1b1   : > { %v166_v62 = vmul.f32 %v165_v61, %v1075_v17 }
 0x1b3   : > { %v168_v63 = vrot.slane %v166_v62, 1 }
 0x1b5   : > { %v170_v0 = vsel %vm59_vm0, %v168_v63, 0.0 }
 0x1b6   : > { %171 = vadd.xlane.f32.xlu2 %v170_v0 }
 0x1ce   : > { %130 = vrot.lane.b32.xlu2 %v1075_v17, %s1014_s29 }
 0x1d6   : > { %233 = vperm.xlu2 %855, %v1067_v8  }
 0x218   : > { %v153_v39 = vpop.xlane.xlu1 %152 }
 0x229   : > { %v172_v7 = vpop.xlane.xlu2 %171 }
 0x22a   : > { %v173_v10 = vrot.slane %v172_v7, 4 }
 0x22c   : > { %v174_v11 = vadd.f32 %v173_v10, %v172_v7 }
 0x22e   : > { %v175_v13 = vrot.slane %v174_v11, 2 }
 0x230   : > { %v176_v14 = vadd.f32 %v175_v13, %v174_v11 }
 0x231   : > { %v131_v15 = vpop.permute.xlu2 %130 }
 0x232   : > { %753 = vpush %v131_v15  ;;  %v177_v18 = vrot.slane %v176_v14, 1 }
 0x233   : > { %755 = vpush %v143_v16 }
 0x234   : > { %v178_v19 = vadd.f32 %v177_v18, %v176_v14 }
 0x236   : > { %757 = vpush %v178_v19 }
 0x239   : > { %v234_v42 = vpop.permute.xlu2 %233 }
 0x263   : > { %s754_s30 = spop %753 }
 0x264   : > { %s756_s4 = spop %755 }
 0x265   : > { %s145_s5 = ssub.f32 %s754_s30, %s756_s4 }
 0x267   : > { %v146_v20 = vstv %s145_s5  ;;  %s758_s6 = spop %757 }
 0x268   : > { %v147_v21 = vmul.f32 %v146_v20, %v125_v47  ;;  %s180_s7 = sadd.f32 1.0, %s758_s6 }
 0x26a   : > { %v1100_v22 = vadd.f32 %v997_v5, %v147_v21  ;;  %v181_v23 = vstv %s180_s7 }
 0x26b   : > { %864 = vrcp.f32 %v181_v23  ;;  %v193_v31 = vand.u32 2147483648, %v181_v23  ;;  %v191_v33 = vand.u32 2147483647, %v181_v23  ;;  %vm187_vm8 = vweird.f32 %v181_v23 }
 0x26c   : > { %v207_v24 = vperm.slane %v1100_v22, 0 }
 0x26d   : > { %v194_v5 = vor.u32 1.1754944e-38, %v193_v31  ;;  %vm192_vm10 = vcmp.eq.f32.partialorder %v191_v33, 8.507059e+37  ;;  %v279_v31 = vrot.slane %v1075_v17, 2 }
 0x26e   : > { %v209_v25 = vmul.f32 %v207_v24, %v1075_v17 }
 0x270   : > { %v211_v26 = vrot.slane %v209_v25, 1 }
 0x271   : > { %v865_v27 = vpop.eup %864 }
 0x272   : > { %v183_v28 = vmul.f32 %v865_v27, %v181_v23  ;;  %v213_v29 = vsel %vm59_vm0, %v211_v26, 0.0  ;;  %vm188_vm7 = vweird.f32 %v865_v27 }
 0x273   : > { %214 = vadd.xlane.f32.xlu2 %v213_v29  ;;  %vm189_vm9 = vmor %vm187_vm8, %vm188_vm7 }
 0x274   : > { %v184_v30 = vsub.f32 1.0, %v183_v28 }
 0x276   : > { %v185_v32 = vmul.f32 %v865_v27, %v184_v30 }
 0x278   : > { %v186_v34 = vadd.f32 %v865_v27, %v185_v32 }
 0x27a   : > { %v190_v35 = vsel %vm189_vm9, %v865_v27, %v186_v34 }
 0x27b   : > { %v195_v36 = vsel %vm192_vm10, %v194_v5, %v190_v35  ;;  %v305_v35 = vperm.slane %v1075_v17, 3 }
 0x27c   : > { %759 = vpush %v195_v36 }
 0x2ad   : > { %s760_s8 = spop %759 }
 0x2ae   : > { %v197_v37 = vstv %s760_s8 }
 0x2af   : > { %v198_v38 = vmul.f32 %v197_v37, %v165_v61 }
 0x2b1   : > { %v199_v40 = vmul.f32 %v198_v38, %v153_v39 }
 0x2b3   : > { %v1107_v43 = vsub.f32 %v1088_v51, %v199_v40 }
 0x2b5   : > { %v236_v44 = vmul.f32 %v234_v42, %v1107_v43  ;;  %v228_v45 = vmul.f32 %v227_v41, %v1107_v43 }
 0x2b7   : > { %v237_v46 = vsel %vm57_vm1, %v236_v44, 0.0  ;;  %v229_v47 = vsel %vm57_vm1, %v228_v45, 0.0 }
 0x2b8   : > { %v238_v48 = vrot.slane %v237_v46, 4  ;;  %230 = vadd.xlane.f32.xlu1 %v229_v47 }
 0x2ba   : > { %v239_v49 = vadd.f32 %v238_v48, %v237_v46 }
 0x2bc   : > { %v240_v50 = vrot.slane %v239_v49, 2 }
 0x2be   : > { %v241_v52 = vadd.f32 %v240_v50, %v239_v49 }
 0x2c0   : > { %v242_v53 = vrot.slane %v241_v52, 1 }
 0x2c2   : > { %v243_v54 = vadd.f32 %v242_v53, %v241_v52 }
 0x2c4   : > { %v244_v55 = vmul.f32 %v243_v54, %v1075_v17 }
 0x2c6   : > { %v246_v56 = vrot.slane %v244_v55, 2 }
 0x2c8   : > { %v248_v51 = vsel %vm59_vm0, %v246_v56, 0.0 }
 0x2c9   : > { %249 = vadd.xlane.f32.xlu0 %v248_v51 }
 0x2dd   : > { %202 = vrot.lane.b32.xlu0 %v201_v57, %s1014_s29 }
 0x2e5   : > { %311 = vperm.xlu0 %856, %v1067_v8  }
 0x2e6   : > { %v215_v59 = vpop.xlane.xlu2 %214 }
 0x2e7   : > { %v216_v60 = vrot.slane %v215_v59, 4 }
 0x2e9   : > { %v217_v63 = vadd.f32 %v216_v60, %v215_v59  ;;  %v357_v59 = vrot.slane %v1075_v17, 3  ;;  %v1017_v60 = vmov 4  }
 0x2ea   : > { %857 = vset.pattern.permute.xlu2 %v1017_v60 }
 0x2eb   : > { %v218_v1 = vrot.slane %v217_v63, 2 }
 0x2ed   : > { %v219_v3 = vadd.f32 %v218_v1, %v217_v63 }
 0x2ef   : > { %v220_v6 = vrot.slane %v219_v3, 1 }
 0x2f1   : > { %v221_v10 = vadd.f32 %v220_v6, %v219_v3 }
 0x32b   : > { %v231_v34 = vpop.xlane.xlu1 %230 }
 0x33c   : > { %v250_v61 = vpop.xlane.xlu0 %249 }
 0x33d   : > { %v251_v62 = vrot.slane %v250_v61, 4 }
 0x33f   : > { %v252_v0 = vadd.f32 %v251_v62, %v250_v61 }
 0x341   : > { %v253_v2 = vrot.slane %v252_v0, 2 }
 0x343   : > { %v254_v4 = vadd.f32 %v253_v2, %v252_v0 }
 0x345   : > { %v255_v7 = vrot.slane %v254_v4, 1 }
 0x347   : > { %v256_v11 = vadd.f32 %v255_v7, %v254_v4 }
 0x34f   : > { %v203_v9 = vpop.permute.xlu0 %202 }
 0x350   : > { %761 = vpush %v203_v9 }
 0x351   : > { %763 = vpush %v221_v10 }
 0x352   : > { %765 = vpush %v256_v11 }
 0x357   : > { %v312_v36 = vpop.permute.xlu0 %311 }
 0x381   : > { %s762_s9 = spop %761 }
 0x382   : > { %s764_s10 = spop %763 }
 0x383   : > { %s223_s11 = ssub.f32 %s762_s9, %s764_s10  ;;  %s766_s12 = spop %765 }
 0x384   : > { %s258_s13 = sadd.f32 1.0, %s766_s12 }
 0x385   : > { %v224_v12 = vstv %s223_s11 }
 0x386   : > { %v225_v13 = vmul.f32 %v224_v12, %v198_v38  ;;  %v259_v14 = vstv %s258_s13 }
 0x387   : > { %866 = vrcp.f32 %v259_v14  ;;  %v271_v25 = vand.u32 2147483648, %v259_v14  ;;  %v269_v27 = vand.u32 2147483647, %v259_v14  ;;  %vm265_vm12 = vweird.f32 %v259_v14 }
 0x388   : > { %v1119_v15 = vadd.f32 %v225_v13, %v1100_v22 }
 0x389   : > { %v272_v22 = vor.u32 1.1754944e-38, %v271_v25  ;;  %vm270_vm14 = vcmp.eq.f32.partialorder %v269_v27, 8.507059e+37 }
 0x38a   : > { %v285_v16 = vperm.slane %v1119_v15, 0 }
 0x38c   : > { %v287_v18 = vmul.f32 %v285_v16, %v1075_v17 }
 0x38d   : > { %v867_v19 = vpop.eup %866 }
 0x38e   : > { %v261_v20 = vmul.f32 %v867_v19, %v259_v14  ;;  %v289_v21 = vrot.slane %v287_v18, 2  ;;  %vm266_vm11 = vweird.f32 %v867_v19 }
 0x38f   : > { %vm267_vm13 = vmor %vm265_vm12, %vm266_vm11 }
 0x390   : > { %v262_v23 = vsub.f32 1.0, %v261_v20  ;;  %v291_v24 = vsel %vm59_vm0, %v289_v21, 0.0 }
 0x391   : > { %292 = vadd.xlane.f32.xlu1 %v291_v24 }
 0x392   : > { %v263_v26 = vmul.f32 %v867_v19, %v262_v23 }
 0x394   : > { %v264_v28 = vadd.f32 %v867_v19, %v263_v26 }
 0x396   : > { %v268_v29 = vsel %vm267_vm13, %v867_v19, %v264_v28 }
 0x397   : > { %v273_v30 = vsel %vm270_vm14, %v272_v22, %v268_v29 }
 0x398   : > { %767 = vpush %v273_v30 }
 0x3aa   : > { %280 = vrot.lane.b32.xlu1 %v279_v31, %s1014_s29 }
 0x3c9   : > { %s768_s14 = spop %767 }
 0x3ca   : > { %v275_v32 = vstv %s768_s14 }
 0x3cb   : > { %v276_v33 = vmul.f32 %v275_v32, %v243_v54 }
 0x3cd   : > { %v277_v5 = vmul.f32 %v276_v33, %v231_v34 }
 0x3cf   : > { %v1128_v37 = vsub.f32 %v1107_v43, %v277_v5 }
 0x3d1   : > { %v314_v38 = vmul.f32 %v312_v36, %v1128_v37  ;;  %v306_v39 = vmul.f32 %v305_v35, %v1128_v37  ;;  %v383_v36 = vperm.slane %v1075_v17, 4 }
 0x3d3   : > { %v315_v40 = vsel %vm57_vm1, %v314_v38, 0.0  ;;  %v307_v41 = vsel %vm57_vm1, %v306_v39, 0.0 }
 0x3d4   : > { %v316_v42 = vrot.slane %v315_v40, 4  ;;  %308 = vadd.xlane.f32.xlu0 %v307_v41 }
 0x3d6   : > { %v317_v44 = vadd.f32 %v316_v42, %v315_v40 }
 0x3d8   : > { %v318_v45 = vrot.slane %v317_v44, 2 }
 0x3da   : > { %v319_v46 = vadd.f32 %v318_v45, %v317_v44 }
 0x3dc   : > { %v320_v47 = vrot.slane %v319_v46, 1 }
 0x3de   : > { %v1134_v48 = vadd.f32 %v320_v47, %v319_v46 }
 0x3e0   : > { %v322_v43 = vmul.f32 %v1134_v48, %v1075_v17 }
 0x3e2   : > { %v324_v49 = vrot.slane %v322_v43, 3 }
 0x3e4   : > { %v326_v50 = vsel %vm59_vm0, %v324_v49, 0.0 }
 0x3e5   : > { %327 = vadd.xlane.f32.xlu2 %v326_v50 }
 0x3e8   : > { %358 = vrot.lane.b32.xlu0 %v357_v59, %s1014_s29  ;;  %v1018_v59 = vmov 5  }
 0x3e9   : > { %858 = vset.pattern.permute.xlu1 %v1018_v59 }
 0x3fd   : > { %389 = vperm.xlu2 %857, %v1067_v8  }
 0x404   : > { %v293_v52 = vpop.xlane.xlu1 %292 }
 0x405   : > { %v294_v53 = vrot.slane %v293_v52, 4 }
 0x407   : > { %v295_v54 = vadd.f32 %v294_v53, %v293_v52 }
 0x409   : > { %v296_v55 = vrot.slane %v295_v54, 2 }
 0x40b   : > { %v297_v56 = vadd.f32 %v296_v55, %v295_v54 }
 0x40d   : > { %v298_v51 = vrot.slane %v297_v56, 1 }
 0x40f   : > { %v299_v58 = vadd.f32 %v298_v51, %v297_v56 }
 0x41c   : > { %v281_v57 = vpop.permute.xlu1 %280 }
 0x41d   : > { %769 = vpush %v281_v57 }
 0x41e   : > { %771 = vpush %v299_v58 }
 0x447   : > { %v309_v26 = vpop.xlane.xlu0 %308 }
 0x44e   : > { %s770_s15 = spop %769 }
 0x44f   : > { %s772_s16 = spop %771 }
 0x450   : > { %s301_s17 = ssub.f32 %s770_s15, %s772_s16 }
 0x452   : > { %v302_v61 = vstv %s301_s17 }
 0x453   : > { %v303_v62 = vmul.f32 %v302_v61, %v276_v33 }
 0x455   : > { %v1143_v63 = vadd.f32 %v303_v62, %v1119_v15 }
 0x457   : > { %v363_v0 = vperm.slane %v1143_v63, 0 }
 0x458   : > { %v328_v1 = vpop.xlane.xlu2 %327 }
 0x459   : > { %v329_v2 = vrot.slane %v328_v1, 4  ;;  %v365_v3 = vmul.f32 %v363_v0, %v1075_v17 }
 0x45a   : > { %v359_v27 = vpop.permute.xlu0 %358 }
 0x45b   : > { %v330_v4 = vadd.f32 %v329_v2, %v328_v1  ;;  %v367_v6 = vrot.slane %v365_v3, 3 }
 0x45d   : > { %v331_v7 = vrot.slane %v330_v4, 2  ;;  %v369_v9 = vsel %vm59_vm0, %v367_v6, 0.0 }
 0x45e   : > { %370 = vadd.xlane.f32.xlu1 %v369_v9 }
 0x45f   : > { %v332_v10 = vadd.f32 %v331_v7, %v330_v4 }
 0x460   : > { %v390_v38 = vpop.permute.xlu2 %389 }
 0x461   : > { %v333_v11 = vrot.slane %v332_v10, 1 }
 0x463   : > { %v334_v12 = vadd.f32 %v333_v11, %v332_v10 }
 0x465   : > { %773 = vpush %v334_v12 }
 0x477   : > { %467 = vperm.xlu1 %858, %v1067_v8  }
 0x496   : > { %s774_s18 = spop %773 }
 0x497   : > { %s336_s19 = sadd.f32 1.0, %s774_s18 }
 0x499   : > { %v337_v13 = vstv %s336_s19 }
 0x49a   : > { %868 = vrcp.f32 %v337_v13  ;;  %v349_v18 = vand.u32 2147483648, %v337_v13  ;;  %v347_v20 = vand.u32 2147483647, %v337_v13  ;;  %vm343_vm2 = vweird.f32 %v337_v13 }
 0x49c   : > { %v350_v23 = vor.u32 1.1754944e-38, %v349_v18  ;;  %vm348_vm4 = vcmp.eq.f32.partialorder %v347_v20, 8.507059e+37 }
 0x4a0   : > { %v869_v14 = vpop.eup %868 }
 0x4a1   : > { %v339_v15 = vmul.f32 %v869_v14, %v337_v13  ;;  %vm344_vm15 = vweird.f32 %v869_v14 }
 0x4a2   : > { %vm345_vm3 = vmor %vm343_vm2, %vm344_vm15 }
 0x4a3   : > { %v340_v16 = vsub.f32 1.0, %v339_v15 }
 0x4a5   : > { %v341_v19 = vmul.f32 %v869_v14, %v340_v16 }
 0x4a7   : > { %v342_v21 = vadd.f32 %v869_v14, %v341_v19 }
 0x4a9   : > { %v346_v24 = vsel %vm345_vm3, %v869_v14, %v342_v21  ;;  %v461_v21 = vperm.slane %v1075_v17, 5 }
 0x4aa   : > { %v351_v25 = vsel %vm348_vm4, %v350_v23, %v346_v24 }
 0x4ab   : > { %775 = vpush %v351_v25 }
 0x4ac   : > { %777 = vpush %v359_v27 }
 0x4d1   : > { %v371_v28 = vpop.xlane.xlu1 %370 }
 0x4d2   : > { %v372_v22 = vrot.slane %v371_v28, 4 }
 0x4d4   : > { %v373_v29 = vadd.f32 %v372_v22, %v371_v28 }
 0x4d6   : > { %v374_v30 = vrot.slane %v373_v29, 2 }
 0x4d8   : > { %v375_v31 = vadd.f32 %v374_v30, %v373_v29 }
 0x4da   : > { %v376_v32 = vrot.slane %v375_v31, 1 }
 0x4dc   : > { %s776_s20 = spop %775  ;;  %v377_v33 = vadd.f32 %v376_v32, %v375_v31 }
 0x4dd   : > { %v353_v34 = vstv %s776_s20  ;;  %s778_s21 = spop %777 }
 0x4de   : > { %v354_v5 = vmul.f32 %v353_v34, %v1134_v48  ;;  %779 = vpush %v377_v33 }
 0x4e0   : > { %v355_v35 = vmul.f32 %v354_v5, %v309_v26 }
 0x4e2   : > { %v1151_v39 = vsub.f32 %v1128_v37, %v355_v35 }
 0x4e4   : > { %v392_v40 = vmul.f32 %v390_v38, %v1151_v39  ;;  %v384_v41 = vmul.f32 %v383_v36, %v1151_v39  ;;  %v435_v36 = vrot.slane %v1075_v17, 4  ;;  %v1019_v38 = vmov 6  }
 0x4e5   : > { %859 = vset.pattern.permute.xlu0 %v1019_v38 }
 0x4e6   : > { %v393_v42 = vsel %vm57_vm1, %v392_v40, 0.0  ;;  %v385_v44 = vsel %vm57_vm1, %v384_v41, 0.0 }
 0x4e7   : > { %v394_v45 = vrot.slane %v393_v42, 4  ;;  %386 = vadd.xlane.f32.xlu0 %v385_v44 }
 0x4e9   : > { %v395_v46 = vadd.f32 %v394_v45, %v393_v42  ;;  %v468_v23 = vpop.permute.xlu1 %467 }
 0x4eb   : > { %v396_v47 = vrot.slane %v395_v46, 2 }
 0x4ed   : > { %v397_v48 = vadd.f32 %v396_v47, %v395_v46 }
 0x4ef   : > { %v398_v43 = vrot.slane %v397_v48, 1 }
 0x4f1   : > { %v399_v49 = vadd.f32 %v398_v43, %v397_v48 }
 0x4f3   : > { %v400_v50 = vmul.f32 %v399_v49, %v1075_v17 }
 0x4f5   : > { %v402_v52 = vrot.slane %v400_v50, 4 }
 0x4f7   : > { %v404_v37 = vsel %vm59_vm0, %v402_v52, 0.0 }
 0x4f8   : > { %405 = vadd.xlane.f32.xlu2 %v404_v37 }
 0x4fb   : > { %545 = vperm.xlu0 %859, %v1067_v8  }
 0x50f   : > { %s780_s22 = spop %779 }
 0x510   : > { %s379_s23 = ssub.f32 %s778_s21, %s780_s22  ;;  %s706_s22 = sshll.u32 (%p65_p0), %s1241_s2, 4  ;;  %s707_s22 = int_to_ptr.hbm [resolvable:$true] %s706_s22 }
 0x512   : > { %v380_v53 = vstv %s379_s23  ;;  %s1021_s23 = smov (%p65_p0), [#allocation7]  }
 0x513   : > { %v381_v54 = vmul.f32 %v380_v53, %v354_v5 }
 0x515   : > { %v1160_v55 = vadd.f32 %v381_v54, %v1143_v63 }
 0x517   : > { %v441_v56 = vperm.slane %v1160_v55, 0 }
 0x519   : > { %v443_v51 = vmul.f32 %v441_v56, %v1075_v17 }
 0x51b   : > { %v445_v57 = vrot.slane %v443_v51, 4 }
 0x51d   : > { %v447_v58 = vsel %vm59_vm0, %v445_v57, 0.0 }
 0x51e   : > { %448 = vadd.xlane.f32.xlu2 %v447_v58 }
 0x55a   : > { %v387_v19 = vpop.xlane.xlu0 %386 }
 0x56b   : > { %v406_v60 = vpop.xlane.xlu2 %405 }
 0x56c   : > { %v407_v61 = vrot.slane %v406_v60, 4 }
 0x56e   : > { %v408_v62 = vadd.f32 %v407_v61, %v406_v60 }
 0x570   : > { %v409_v0 = vrot.slane %v408_v62, 2 }
 0x572   : > { %v410_v1 = vadd.f32 %v409_v0, %v408_v62 }
 0x574   : > { %v411_v2 = vrot.slane %v410_v1, 1 }
 0x576   : > { %v412_v63 = vadd.f32 %v411_v2, %v410_v1 }
 0x578   : > { %781 = vpush %v412_v63 }
 0x5a9   : > { %s782_s1 = spop %781 }
 0x5aa   : > { %s414_s24 = sadd.f32 1.0, %s782_s1  ;;  %s704_s1 = sshll.u32 (%p65_p0), %s1021_s23, 4  ;;  %s705_s1 = int_to_ptr.vmem [resolvable:$true] %s704_s1 }
 0x5ac   : > { %v415_v3 = vstv %s414_s24  ;;  %s1022_s24 = smov (%p65_p0), [#allocation8]  }
 0x5ad   : > { %870 = vrcp.f32 %v415_v3  ;;  %v427_v9 = vand.u32 2147483648, %v415_v3  ;;  %v425_v11 = vand.u32 2147483647, %v415_v3  ;;  %vm421_vm6 = vweird.f32 %v415_v3 }
 0x5af   : > { %v428_v13 = vor.u32 1.1754944e-38, %v427_v9  ;;  %vm426_vm8 = vcmp.eq.f32.partialorder %v425_v11, 8.507059e+37 }
 0x5b3   : > { %v871_v4 = vpop.eup %870 }
 0x5b4   : > { %v417_v6 = vmul.f32 %v871_v4, %v415_v3  ;;  %vm422_vm5 = vweird.f32 %v871_v4 }
 0x5b5   : > { %vm423_vm7 = vmor %vm421_vm6, %vm422_vm5 }
 0x5b6   : > { %v418_v7 = vsub.f32 1.0, %v417_v6 }
 0x5b8   : > { %v419_v10 = vmul.f32 %v871_v4, %v418_v7 }
 0x5ba   : > { %v420_v12 = vadd.f32 %v871_v4, %v419_v10 }
 0x5bc   : > { %v424_v14 = vsel %vm423_vm7, %v871_v4, %v420_v12 }
 0x5bd   : > { %v429_v15 = vsel %vm426_vm8, %v428_v13, %v424_v14  ;;  %v539_v13 = vperm.slane %v1075_v17, 6  ;;  %v546_v14 = vpop.permute.xlu0 %545 }
 0x5be   : > { %783 = vpush %v429_v15 }
 0x5ef   : > { %s784_s26 = spop %783 }
 0x5f0   : > { %v431_v16 = vstv %s784_s26  ;;  %s715_s26 = sshll.u32 (%p65_p0), %s1022_s24, 4  ;;  %s716_s26 = int_to_ptr.vmem [resolvable:$true] %s715_s26 }
 0x5f1   : > { %v432_v18 = vmul.f32 %v431_v16, %v399_v49 }
 0x5f3   : > { %v433_v20 = vmul.f32 %v432_v18, %v387_v19 }
 0x5f5   : > { %v1168_v24 = vsub.f32 %v1151_v39, %v433_v20  ;;  %v449_v39 = vpop.xlane.xlu2 %448 }
 0x5f6   : > { %v450_v40 = vrot.slane %v449_v39, 4 }
 0x5f7   : > { %v470_v25 = vmul.f32 %v468_v23, %v1168_v24  ;;  %v462_v26 = vmul.f32 %v461_v21, %v1168_v24 }
 0x5f8   : > { %v451_v41 = vadd.f32 %v450_v40, %v449_v39 }
 0x5f9   : > { %v471_v27 = vsel %vm57_vm1, %v470_v25, 0.0  ;;  %v463_v28 = vsel %vm57_vm1, %v462_v26, 0.0 }
 0x5fa   : > { %v472_v22 = vrot.slane %v471_v27, 4  ;;  %464 = vadd.xlane.f32.xlu1 %v463_v28  ;;  %v452_v42 = vrot.slane %v451_v41, 2 }
 0x5fc   : > { %v473_v29 = vadd.f32 %v472_v22, %v471_v27  ;;  %v453_v45 = vadd.f32 %v452_v42, %v451_v41 }
 0x5fe   : > { %v474_v30 = vrot.slane %v473_v29, 2  ;;  %v454_v48 = vrot.slane %v453_v45, 1 }
 0x600   : > { %v475_v31 = vadd.f32 %v474_v30, %v473_v29  ;;  %v455_v52 = vadd.f32 %v454_v48, %v453_v45  ;;  %v513_v30 = vrot.slane %v1075_v17, 5 }
 0x602   : > { %v476_v32 = vrot.slane %v475_v31, 1 }
 0x604   : > { %v477_v33 = vadd.f32 %v476_v32, %v475_v31  ;;  %v1020_v31 = vmov 7  }
 0x605   : > { %860 = vset.pattern.permute.xlu2 %v1020_v31  ;;  %861 = vset.pattern.permute.xlu0 %v1020_v31 }
 0x606   : > { %v478_v34 = vmul.f32 %v477_v33, %v1075_v17 }
 0x608   : > { %v480_v5 = vrot.slane %v478_v34, 5 }
 0x60a   : > { %v482_v35 = vsel %vm59_vm0, %v480_v5, 0.0 }
 0x60b   : > { %483 = vadd.xlane.f32.xlu2 %v482_v35 }
 0x623   : > { %436 = vrot.lane.b32.xlu2 %v435_v36, %s1014_s29 }
 0x66d   : > { %v465_v11 = vpop.xlane.xlu1 %464 }
 0x67e   : > { %v484_v44 = vpop.xlane.xlu2 %483 }
 0x67f   : > { %v485_v46 = vrot.slane %v484_v44, 4 }
 0x681   : > { %v486_v47 = vadd.f32 %v485_v46, %v484_v44 }
 0x683   : > { %v487_v43 = vrot.slane %v486_v47, 2 }
 0x685   : > { %v488_v49 = vadd.f32 %v487_v43, %v486_v47 }
 0x686   : > { %v437_v50 = vpop.permute.xlu2 %436 }
 0x687   : > { %785 = vpush %v437_v50  ;;  %v489_v37 = vrot.slane %v488_v49, 1 }
 0x688   : > { %787 = vpush %v455_v52 }
 0x689   : > { %v490_v53 = vadd.f32 %v489_v37, %v488_v49 }
 0x68b   : > { %789 = vpush %v490_v53 }
 0x6b8   : > { %s786_s27 = spop %785 }
 0x6b9   : > { %s788_s28 = spop %787 }
 0x6ba   : > { %s457_s30 = ssub.f32 %s786_s27, %s788_s28 }
 0x6bc   : > { %v458_v54 = vstv %s457_s30  ;;  %s790_s4 = spop %789 }
 0x6bd   : > { %v459_v56 = vmul.f32 %v458_v54, %v432_v18  ;;  %s492_s5 = sadd.f32 1.0, %s790_s4 }
 0x6bf   : > { %v1180_v51 = vadd.f32 %v459_v56, %v1160_v55  ;;  %v493_v57 = vstv %s492_s5 }
 0x6c0   : > { %872 = vrcp.f32 %v493_v57  ;;  %v505_v2 = vand.u32 2147483648, %v493_v57  ;;  %v503_v3 = vand.u32 2147483647, %v493_v57  ;;  %vm499_vm10 = vweird.f32 %v493_v57 }
 0x6c1   : > { %v519_v58 = vperm.slane %v1180_v51, 0 }
 0x6c2   : > { %v506_v55 = vor.u32 1.1754944e-38, %v505_v2  ;;  %vm504_vm12 = vcmp.eq.f32.partialorder %v503_v3, 8.507059e+37 }
 0x6c3   : > { %v521_v59 = vmul.f32 %v519_v58, %v1075_v17 }
 0x6c5   : > { %v523_v60 = vrot.slane %v521_v59, 5 }
 0x6c6   : > { %v873_v61 = vpop.eup %872 }
 0x6c7   : > { %v495_v62 = vmul.f32 %v873_v61, %v493_v57  ;;  %v525_v0 = vsel %vm59_vm0, %v523_v60, 0.0  ;;  %vm500_vm9 = vweird.f32 %v873_v61 }
 0x6c8   : > { %526 = vadd.xlane.f32.xlu2 %v525_v0  ;;  %vm501_vm11 = vmor %vm499_vm10, %vm500_vm9 }
 0x6c9   : > { %v496_v1 = vsub.f32 1.0, %v495_v62 }
 0x6cb   : > { %v497_v63 = vmul.f32 %v873_v61, %v496_v1 }
 0x6cd   : > { %v498_v4 = vadd.f32 %v873_v61, %v497_v63 }
 0x6cf   : > { %v502_v6 = vsel %vm501_vm11, %v873_v61, %v498_v4 }
 0x6d0   : > { %v507_v7 = vsel %vm504_vm12, %v506_v55, %v502_v6  ;;  %v617_v55 = vperm.slane %v1075_v17, 7 }
 0x6d1   : > { %791 = vpush %v507_v7 }
 0x6e0   : > { %623 = vperm.xlu2 %860, %v1067_v8   ;;  %v591_v8 = vrot.slane %v1075_v17, 6 }
 0x6e8   : > { %592 = vrot.lane.b32.xlu2 %v591_v8, %s1014_s29 }
 0x702   : > { %s792_s6 = spop %791 }
 0x703   : > { %v509_v9 = vstv %s792_s6 }
 0x704   : > { %v510_v10 = vmul.f32 %v509_v9, %v477_v33 }
 0x706   : > { %v511_v12 = vmul.f32 %v510_v10, %v465_v11 }
 0x708   : > { %v1187_v15 = vsub.f32 %v1168_v24, %v511_v12 }
 0x70a   : > { %v548_v16 = vmul.f32 %v546_v14, %v1187_v15  ;;  %v540_v18 = vmul.f32 %v539_v13, %v1187_v15 }
 0x70c   : > { %v549_v19 = vsel %vm57_vm1, %v548_v16, 0.0  ;;  %v541_v20 = vsel %vm57_vm1, %v540_v18, 0.0 }
 0x70d   : > { %v550_v21 = vrot.slane %v549_v19, 4  ;;  %542 = vadd.xlane.f32.xlu0 %v541_v20 }
 0x70f   : > { %v551_v23 = vadd.f32 %v550_v21, %v549_v19 }
 0x711   : > { %v552_v25 = vrot.slane %v551_v23, 2 }
 0x713   : > { %v553_v26 = vadd.f32 %v552_v25, %v551_v23 }
 0x715   : > { %v554_v27 = vrot.slane %v553_v26, 1 }
 0x717   : > { %v1193_v28 = vadd.f32 %v554_v27, %v553_v26 }
 0x719   : > { %v556_v24 = vmul.f32 %v1193_v28, %v1075_v17 }
 0x71b   : > { %v558_v22 = vrot.slane %v556_v24, 6 }
 0x71d   : > { %v560_v29 = vsel %vm59_vm0, %v558_v22, 0.0 }
 0x71e   : > { %561 = vadd.xlane.f32.xlu1 %v560_v29 }
 0x737   : > { %514 = vrot.lane.b32.xlu1 %v513_v30, %s1014_s29 }
 0x73b   : > { %v527_v32 = vpop.xlane.xlu2 %526 }
 0x73c   : > { %v528_v34 = vrot.slane %v527_v32, 4 }
 0x73e   : > { %v529_v35 = vadd.f32 %v528_v34, %v527_v32 }
 0x740   : > { %v530_v38 = vrot.slane %v529_v35, 2 }
 0x742   : > { %v531_v40 = vadd.f32 %v530_v38, %v529_v35 }
 0x743   : > { %v624_v6 = vpop.permute.xlu2 %623 }
 0x744   : > { %v532_v42 = vrot.slane %v531_v40, 1 }
 0x746   : > { %v533_v46 = vadd.f32 %v532_v42, %v531_v40 }
 0x74b   : > { %v593_v25 = vpop.permute.xlu2 %592 }
 0x780   : > { %v543_v3 = vpop.xlane.xlu0 %542 }
 0x791   : > { %v562_v33 = vpop.xlane.xlu1 %561 }
 0x792   : > { %v563_v5 = vrot.slane %v562_v33, 4 }
 0x794   : > { %v564_v36 = vadd.f32 %v563_v5, %v562_v33 }
 0x796   : > { %v565_v39 = vrot.slane %v564_v36, 2 }
 0x798   : > { %v566_v41 = vadd.f32 %v565_v39, %v564_v36 }
 0x79a   : > { %v567_v44 = vrot.slane %v566_v41, 1 }
 0x79c   : > { %v568_v47 = vadd.f32 %v567_v44, %v566_v41 }
 0x7a9   : > { %v515_v45 = vpop.permute.xlu1 %514 }
 0x7aa   : > { %793 = vpush %v515_v45 }
 0x7ab   : > { %795 = vpush %v533_v46 }
 0x7ac   : > { %797 = vpush %v568_v47 }
 0x7db   : > { %s794_s7 = spop %793 }
 0x7dc   : > { %s796_s8 = spop %795 }
 0x7dd   : > { %s535_s9 = ssub.f32 %s794_s7, %s796_s8  ;;  %s798_s10 = spop %797 }
 0x7de   : > { %s570_s11 = sadd.f32 1.0, %s798_s10 }
 0x7df   : > { %v536_v48 = vstv %s535_s9 }
 0x7e0   : > { %v537_v43 = vmul.f32 %v536_v48, %v510_v10  ;;  %v571_v49 = vstv %s570_s11 }
 0x7e1   : > { %874 = vrcp.f32 %v571_v49  ;;  %v583_v59 = vand.u32 2147483648, %v571_v49  ;;  %v581_v61 = vand.u32 2147483647, %v571_v49  ;;  %vm577_vm14 = vweird.f32 %v571_v49 }
 0x7e2   : > { %v538_v50 = vadd.f32 %v537_v43, %v1180_v51 }
 0x7e3   : > { %v584_v0 = vor.u32 1.1754944e-38, %v583_v59  ;;  %vm582_vm2 = vcmp.eq.f32.partialorder %v581_v61, 8.507059e+37 }
 0x7e4   : > { %v597_v52 = vperm.slane %v538_v50, 0 }
 0x7e6   : > { %v599_v37 = vmul.f32 %v597_v52, %v1075_v17  ;;  %v878_v17 = vld [vmem:[%s1072_s25] sm:$0xff] }
 0x7e7   : > { %v875_v53 = vpop.eup %874  ;;  %v669_v45 = vrot.slane %v878_v17, 7 }
 0x7e8   : > { %v573_v54 = vmul.f32 %v875_v53, %v571_v49  ;;  %v601_v56 = vrot.slane %v599_v37, 6  ;;  %vm578_vm13 = vweird.f32 %v875_v53 }
 0x7e9   : > { %vm579_vm15 = vmor %vm577_vm14, %vm578_vm13 }
 0x7ea   : > { %v574_v57 = vsub.f32 1.0, %v573_v54  ;;  %v603_v58 = vsel %vm59_vm0, %v601_v56, 0.0 }
 0x7eb   : > { %604 = vadd.xlane.f32.xlu1 %v603_v58 }
 0x7ec   : > { %v575_v60 = vmul.f32 %v875_v53, %v574_v57 }
 0x7ee   : > { %v576_v62 = vadd.f32 %v875_v53, %v575_v60 }
 0x7f0   : > { %v580_v1 = vsel %vm579_vm15, %v875_v53, %v576_v62 }
 0x7f1   : > { %v585_v51 = vsel %vm582_vm2, %v584_v0, %v580_v1 }
 0x7f2   : > { %799 = vpush %v585_v51 }
 0x7f3   : > { %801 = vpush %v593_v25 }
 0x823   : > { %s800_s12 = spop %799 }
 0x824   : > { %v587_v2 = vstv %s800_s12  ;;  %s802_s13 = spop %801 }
 0x825   : > { %v588_v63 = vmul.f32 %v587_v2, %v1193_v28 }
 0x827   : > { %v589_v4 = vmul.f32 %v588_v63, %v543_v3 }
 0x829   : > { %v1209_v7 = vsub.f32 %v1187_v15, %v589_v4 }
 0x82b   : > { %v626_v9 = vmul.f32 %v624_v6, %v1209_v7  ;;  %v618_v10 = vmul.f32 %v617_v55, %v1209_v7 }
 0x82d   : > { %v627_v11 = vsel %vm57_vm1, %v626_v9, 0.0  ;;  %v619_v12 = vsel %vm57_vm1, %v618_v10, 0.0 }
 0x82e   : > { %v628_v13 = vrot.slane %v627_v11, 4  ;;  %620 = vadd.xlane.f32.xlu1 %v619_v12 }
 0x830   : > { %v629_v14 = vadd.f32 %v628_v13, %v627_v11 }
 0x832   : > { %v630_v16 = vrot.slane %v629_v14, 2 }
 0x834   : > { %v631_v18 = vadd.f32 %v630_v16, %v629_v14 }
 0x836   : > { %v632_v19 = vrot.slane %v631_v18, 1 }
 0x838   : > { %v1215_v20 = vadd.f32 %v632_v19, %v631_v18 }
 0x83a   : > { %v634_v15 = vmul.f32 %v878_v17, %v1215_v20 }
 0x83c   : > { %v636_v21 = vrot.slane %v634_v15, 7 }
 0x83e   : > { %v638_v23 = vsel %vm59_vm0, %v636_v21, 0.0 }
 0x83f   : > { %639 = vadd.xlane.f32.xlu2 %v638_v23 }
 0x85e   : > { %v605_v26 = vpop.xlane.xlu1 %604 }
 0x85f   : > { %v606_v27 = vrot.slane %v605_v26, 4 }
 0x861   : > { %v607_v28 = vadd.f32 %v606_v27, %v605_v26 }
 0x863   : > { %v608_v24 = vrot.slane %v607_v28, 2 }
 0x865   : > { %v609_v22 = vadd.f32 %v608_v24, %v607_v28 }
 0x867   : > { %v610_v29 = vrot.slane %v609_v22, 1 }
 0x869   : > { %v611_v30 = vadd.f32 %v610_v29, %v609_v22 }
 0x86b   : > { %803 = vpush %v611_v30 }
 0x89c   : > { %s804_s14 = spop %803 }
 0x89d   : > { %s613_s15 = ssub.f32 %s802_s13, %s804_s14 }
 0x89f   : > { %v614_v31 = vstv %s613_s15 }
 0x8a0   : > { %v615_v32 = vmul.f32 %v614_v31, %v588_v63 }
 0x8a1   : > { %v621_v63 = vpop.xlane.xlu1 %620 }
 0x8a2   : > { %v616_v33 = vadd.f32 %v615_v32, %v538_v50 }
 0x8a4   : > { %v675_v34 = vperm.slane %v616_v33, 0 }
 0x8a6   : > { %v677_v5 = vmul.f32 %v878_v17, %v675_v34 }
 0x8a8   : > { %v679_v35 = vrot.slane %v677_v5, 7 }
 0x8aa   : > { %v681_v36 = vsel %vm59_vm0, %v679_v35, 0.0 }
 0x8ab   : > { %682 = vadd.xlane.f32.xlu0 %v681_v36 }
 0x8b2   : > { %v640_v38 = vpop.xlane.xlu2 %639 }
 0x8b3   : > { %v641_v39 = vrot.slane %v640_v38, 4 }
 0x8b5   : > { %v642_v40 = vadd.f32 %v641_v39, %v640_v38 }
 0x8b7   : > { %v643_v41 = vrot.slane %v642_v40, 2 }
 0x8b9   : > { %v644_v42 = vadd.f32 %v643_v41, %v642_v40 }
 0x8bb   : > { %v645_v44 = vrot.slane %v644_v42, 1 }
 0x8bd   : > { %v646_v46 = vadd.f32 %v645_v44, %v644_v42 }
 0x8bf   : > { %805 = vpush %v646_v46  ;;  %670 = vrot.lane.b32.xlu0 %v669_v45, %s1014_s29 }
 0x8f0   : > { %s806_s25 = spop %805 }
 0x8f1   : > { %s648_s16 = sadd.f32 1.0, %s806_s25 }
 0x8f3   : > { %v649_v47 = vstv %s648_s16 }
 0x8f4   : > { %876 = vrcp.f32 %v649_v47  ;;  %v661_v49 = vand.u32 2147483648, %v649_v47  ;;  %v659_v52 = vand.u32 2147483647, %v649_v47  ;;  %vm655_vm4 = vweird.f32 %v649_v47 }
 0x8f6   : > { %v662_v53 = vor.u32 1.1754944e-38, %v661_v49  ;;  %vm660_vm6 = vcmp.eq.f32.partialorder %v659_v52, 8.507059e+37 }
 0x8fa   : > { %v877_v8 = vpop.eup %876 }
 0x8fb   : > { %v651_v48 = vmul.f32 %v877_v8, %v649_v47  ;;  %vm656_vm3 = vweird.f32 %v877_v8 }
 0x8fc   : > { %vm657_vm5 = vmor %vm655_vm4, %vm656_vm3 }
 0x8fd   : > { %v652_v43 = vsub.f32 1.0, %v651_v48 }
 0x8ff   : > { %v653_v50 = vmul.f32 %v877_v8, %v652_v43 }
 0x901   : > { %v654_v37 = vadd.f32 %v877_v8, %v653_v50 }
 0x903   : > { %v658_v54 = vsel %vm657_vm5, %v877_v8, %v654_v37 }
 0x904   : > { %v663_v56 = vsel %vm660_vm6, %v662_v53, %v658_v54 }
 0x905   : > { %807 = vpush %v663_v56 }
 0x91e   : > { %v683_v57 = vpop.xlane.xlu0 %682 }
 0x91f   : > { %v684_v58 = vrot.slane %v683_v57, 4 }
 0x921   : > { %v685_v59 = vadd.f32 %v684_v58, %v683_v57 }
 0x923   : > { %v686_v60 = vrot.slane %v685_v59, 2 }
 0x925   : > { %v687_v61 = vadd.f32 %v686_v60, %v685_v59 }
 0x927   : > { %v688_v62 = vrot.slane %v687_v61, 1 }
 0x929   : > { %v689_v1 = vadd.f32 %v688_v62, %v687_v61 }
 0x931   : > { %v671_v0 = vpop.permute.xlu0 %670 }
 0x932   : > { %809 = vpush %v671_v0 }
 0x933   : > { %811 = vpush %v689_v1 }
 0x936   : > { %s808_s29 = spop %807 }
 0x937   : > { %v665_v51 = vstv %s808_s29 }
 0x938   : > { %v666_v2 = vmul.f32 %v665_v51, %v1215_v20 }
 0x93a   : > { %v667_v3 = vmul.f32 %v666_v2, %v621_v63 }
 0x93c   : > { %v668_v4 = vsub.f32 %v1209_v7, %v667_v3  }
 0x93e   :  { %696 = vst.msk [vmem:[#allocation7] sm:$0xff] (%p65_p0), %vm57_vm1, %v668_v4 }
 0x93f   :  { %709 = dma.vmem_to_hbm [thread:$0]  (%p65_p0), %s705_s1, 128, %s707_s22, [#allocation4]  }
 0x963   : > { %s810_s17 = spop %809 }
 0x964   : > { %s812_s18 = spop %811 }
 0x965   : > { %s691_s19 = ssub.f32 %s810_s17, %s812_s18 }
 0x967   : > { %v692_v55 = vstv %s691_s19 }
 0x968   : > { %v693_v6 = vmul.f32 %v692_v55, %v666_v2  ;;  %67 = sbr.rel (!%p65_p0) target bundleno = 27 (0x1b), region = 57 }
 0x96a   : > { %v694_v9 = vadd.f32 %v693_v6, %v616_v33   ;;  %v1244_v6 = vmov %v668_v4 }
 0x96c   : > { %v1243_v5 = vmov %v694_v9  ;;  %698 = vst.msk [vmem:[#allocation8] sm:$0x1] (%p65_p0), %vm59_vm0, %v694_v9 }
 0x96d   :  { %720 = dma.vmem_to_hbm [thread:$0]  %s716_s26, 16, %s718_s0, [#allocation9]  }
 0x96e   :  { %991 = dma.done.wait [#allocation4], 128  }
 0x96f   :  { %992 = vsyncadd [#allocation4], 4294967168 }
 0x970   :  { %993 = dma.done.wait [#allocation9], 16  }
 0x971   :  { %994 = vsyncadd [#allocation9], 4294967280 }
 0x972   :  { %729 = vsyncpa [#allocation3], 1 }
 0x973   :  { %730 = vsyncpa [#allocation6], 1 }
 0x974   :  { %731 = vsyncpa [#allocation4], 1 }
 0x975   :  { %732 = vsyncpa [#allocation9], 1 }

</bundles_post_ra>
